<compile_context>
chip_gen: v7x
topology: tpu7x:2x2x1
jax: 0.10.0
libtpu: 0.0.40
codegen_flags: <defaults>
</compile_context>

<pallas_src>
import math
from functools import partial

import jax
import jax.numpy as jnp
from jax.experimental import pallas as pl
from jax.experimental.pallas import tpu as pltpu

EPS = 1e-6


# ----------------------------- in-kernel helpers -----------------------------

def _layer_norm(x, gamma, beta):
    # f32 statistics; rsqrt maps to the EUP.
    mean = jnp.mean(x, axis=-1, keepdims=True)
    var = jnp.mean((x - mean) ** 2, axis=-1, keepdims=True)
    return (x - mean) * jax.lax.rsqrt(var + EPS) * gamma + beta


def _split_heads(t, n_head, d_k):
    # [L, H*d_k] -> [H, L, d_k].  Kept after the WIDE fused projection matmul (full MXU width);
    # for K/V this runs only once per batch element (hoisted), for Q only on the small q tile.
    return jnp.stack([t[:, h * d_k:(h + 1) * d_k] for h in range(n_head)], axis=0)


def _mha(q2d, kh, vh, wo3, n_head, d_k, cdt, approx_recip):
    """Multi-head attention core for one q tile.

    q2d: [TQ, D] f32 (softmax scale already folded into Wq).
    kh, vh: [H, Lk, dk] in compute dtype (read from hoisted VMEM scratch).
    wo3: [H, dk, D] output-projection weight (compute dtype).
    Returns [TQ, D] f32.
    """
    qh = _split_heads(q2d.astype(cdt), n_head, d_k)                      # [H, TQ, dk]

    # scores + softmax statistics in f32
    s = jnp.einsum('hqd,hkd->hqk', qh, kh,
                   preferred_element_type=jnp.float32)                   # [H, TQ, Lk]
    s = s - jnp.max(s, axis=-1, keepdims=True)
    p = jnp.exp(s)
    l = jnp.sum(p, axis=-1, keepdims=True)                               # [H, TQ, 1] f32

    # un-normalized PV matmul (bf16 operands, f32 accumulation)
    ctx = jnp.einsum('hqk,hkd->hqd', p.astype(cdt), vh,
                     preferred_element_type=jnp.float32)                 # [H, TQ, dk]
    # deferred softmax normalization on the small tensor (not on [H, TQ, Lk])
    ctx = ctx * pl.reciprocal(l, approx=approx_recip)

    # per-head output projection summed over heads == concat(heads) @ Wo
    out = jnp.einsum('hqd,hdm->hqm', ctx.astype(cdt), wo3,
                     preferred_element_type=jnp.float32)                 # [H, TQ, D]
    return jnp.sum(out, axis=0)                                          # [TQ, D]


# ----------------------------- fused kernel ----------------------------------

def decoder_layer_kernel(dec_ref, enc_ref,
                         slf_wq_ref, slf_wkv_ref, slf_wo3_ref, slf_g_ref, slf_b_ref,
                         enc_wq_ref, enc_wkv_ref, enc_wo3_ref, enc_g_ref, enc_b_ref,
                         w1_ref, b1_ref, w2_ref, b2_ref, ffn_g_ref, ffn_b_ref,
                         o_ref,
                         slf_k_scr, slf_v_scr, enc_k_scr, enc_v_scr,
                         *, n_head, d_k, tile_q, compute_dtype, approx_recip):
    D = n_head * d_k
    cdt = compute_dtype
    qi = pl.program_id(1)

    # ---- hoisted K/V projections: once per batch element, reused by every q tile ----
    @pl.when(qi == 0)
    def _():
        dec_full = dec_ref[0].astype(cdt)                                       # [Lq, D]
        kv = jnp.dot(dec_full, slf_wkv_ref[...],
                     preferred_element_type=jnp.float32).astype(cdt)            # [Lq, 2D]
        slf_k_scr[...] = _split_heads(kv[:, :D], n_head, d_k)
        slf_v_scr[...] = _split_heads(kv[:, D:], n_head, d_k)

        enc_full = enc_ref[0].astype(cdt)                                       # [Lk, D]
        kv = jnp.dot(enc_full, enc_wkv_ref[...],
                     preferred_element_type=jnp.float32).astype(cdt)            # [Lk, 2D]
        enc_k_scr[...] = _split_heads(kv[:, :D], n_head, d_k)
        enc_v_scr[...] = _split_heads(kv[:, D:], n_head, d_k)

    # ---- residual stream for this q tile (kept in f32 for LN precision) ----
    q_start = pl.multiple_of(qi * tile_q, tile_q)
    x = dec_ref[0, pl.ds(q_start, tile_q), :].astype(jnp.float32)               # [TQ, D]

    # ---- self-attention sub-layer (scale folded into Wq) ----
    q = jnp.dot(x.astype(cdt), slf_wq_ref[...], preferred_element_type=jnp.float32)
    attn = _mha(q, slf_k_scr[...], slf_v_scr[...], slf_wo3_ref[...],
                n_head, d_k, cdt, approx_recip)
    x = _layer_norm(attn + x, slf_g_ref[...], slf_b_ref[...])

    # ---- encoder-decoder (cross) attention sub-layer ----
    q = jnp.dot(x.astype(cdt), enc_wq_ref[...], preferred_element_type=jnp.float32)
    attn = _mha(q, enc_k_scr[...], enc_v_scr[...], enc_wo3_ref[...],
                n_head, d_k, cdt, approx_recip)
    x = _layer_norm(attn + x, enc_g_ref[...], enc_b_ref[...])

    # ---- position-wise FFN sub-layer ----
    h = jnp.dot(x.astype(cdt), w1_ref[...], preferred_element_type=jnp.float32) + b1_ref[...]
    h = jnp.maximum(h, 0.0)
    y = jnp.dot(h.astype(cdt), w2_ref[...], preferred_element_type=jnp.float32) + b2_ref[...]
    x = _layer_norm(y + x, ffn_g_ref[...], ffn_b_ref[...])

    o_ref[0] = x.astype(o_ref.dtype)


# ----------------------------- wrapper ----------------------------------------

def decoder_layer(dec_input, enc_output, params, n_head, *,
                  tile_q=None, compute_dtype=jnp.bfloat16):
    B, Lq, D = dec_input.shape
    Lk = enc_output.shape[1]
    d_k = D // n_head
    Di = params["ffn_w1"].shape[1]
    scale = 1.0 / math.sqrt(d_k)
    cdt = jnp.dtype(compute_dtype)
    approx_recip = (cdt != jnp.dtype(jnp.float32))   # approx EUP reciprocal on the bf16 path

    if tile_q is None:
        # v5e-friendly default; use 256 on v6e/v7x to fill the 2x256 MXU (VMEM permitting).
        tile_q = Lq if Lq <= 128 else 128
    assert Lq % tile_q == 0, "TODO(synk): pad/mask ragged Lq instead of requiring divisibility"
    n_qt = Lq // tile_q

    # Trace-time weight preparation (free, runs once outside the kernel):
    #   - fold softmax 1/sqrt(d_k) into Wq
    #   - fuse K|V projection weights into one [D, 2D] (wide MXU contraction, hoisted in-kernel)
    #   - reshape Wo to per-head [H, d_k, D]
    #   - pre-cast matmul weights to the compute dtype (bf16 on v5e/v6e/v7x MXU)
    slf_wq = (params["slf_wq"] * scale).astype(cdt)
    slf_wkv = jnp.concatenate([params["slf_wk"], params["slf_wv"]], axis=1).astype(cdt)
    slf_wo3 = params["slf_wo"].reshape(n_head, d_k, D).astype(cdt)
    enc_wq = (params["enc_wq"] * scale).astype(cdt)
    enc_wkv = jnp.concatenate([params["enc_wk"], params["enc_wv"]], axis=1).astype(cdt)
    enc_wo3 = params["enc_wo"].reshape(n_head, d_k, D).astype(cdt)
    ffn_w1 = params["ffn_w1"].astype(cdt)
    ffn_w2 = params["ffn_w2"].astype(cdt)
    # biases / LayerNorm params stay f32 (applied to f32 accumulators)

    # Grid-invariant weights: whole-array, resident in VMEM, single-buffered (no per-step DMA,
    # no double-buffer allocation) -- halves weight VMEM vs. blocked double-buffered specs.
    wspec = pl.BlockSpec(memory_space=pltpu.MemorySpace.VMEM)

    return pl.pallas_call(
        partial(decoder_layer_kernel, n_head=n_head, d_k=d_k, tile_q=tile_q,
                compute_dtype=cdt, approx_recip=approx_recip),
        out_shape=jax.ShapeDtypeStruct((B, Lq, D), dec_input.dtype),
        grid=(B, n_qt),
        in_specs=[
            # full decoder / encoder sequences for this batch element; index map constant in qi,
            # so they are DMA'd only when b changes (and the q tile is sliced from the dec block).
            pl.BlockSpec((1, Lq, D), lambda b, q: (b, 0, 0)),
            pl.BlockSpec((1, Lk, D), lambda b, q: (b, 0, 0)),
            wspec, wspec, wspec, wspec, wspec,        # self-attn: Wq, Wkv, Wo3, LN gamma/beta
            wspec, wspec, wspec, wspec, wspec,        # cross-attn: Wq, Wkv, Wo3, LN gamma/beta
            wspec, wspec, wspec, wspec, wspec, wspec, # FFN: w1, b1, w2, b2, LN gamma/beta
        ],
        out_specs=pl.BlockSpec((1, tile_q, D), lambda b, q: (b, q, 0)),
        scratch_shapes=[
            pltpu.VMEM((n_head, Lq, d_k), cdt),   # self-attn K (head-split, hoisted)
            pltpu.VMEM((n_head, Lq, d_k), cdt),   # self-attn V
            pltpu.VMEM((n_head, Lk, d_k), cdt),   # cross-attn K
            pltpu.VMEM((n_head, Lk, d_k), cdt),   # cross-attn V
        ],
        compiler_params=pltpu.CompilerParams(
            # Batch axis parallel (feeds both v7x TCs); q-tile axis must be "arbitrary" because
            # the hoisted K/V scratch is written only at q_tile == 0.
            dimension_semantics=("parallel", "arbitrary"),
            vmem_limit_bytes=48 * 1024 * 1024,
        ),
    )(dec_input, enc_output,
      slf_wq, slf_wkv, slf_wo3, params["slf_g"], params["slf_b"],
      enc_wq, enc_wkv, enc_wo3, params["enc_g"], params["enc_b"],
      ffn_w1, params["ffn_b1"], ffn_w2, params["ffn_b2"],
      params["ffn_g"], params["ffn_b"])


# ----------------------------- pure-JAX reference ----------------------------

def _mha_ref(x, kv, wq, wk, wv, wo, gamma, beta, n_head):
    B, Lq, D = x.shape
    Lk = kv.shape[1]
    d_k = D // n_head
    q = (x @ wq).reshape(B, Lq, n_head, d_k).transpose(0, 2, 1, 3)
    k = (kv @ wk).reshape(B, Lk, n_head, d_k).transpose(0, 2, 1, 3)
    v = (kv @ wv).reshape(B, Lk, n_head, d_k).transpose(0, 2, 1, 3)
    s = jnp.einsum("bhqd,bhkd->bhqk", q, k) / math.sqrt(d_k)
    p = jax.nn.softmax(s, axis=-1)
    o = jnp.einsum("bhqk,bhkd->bhqd", p, v).transpose(0, 2, 1, 3).reshape(B, Lq, D)
    o = o @ wo + x
    return _layer_norm(o, gamma, beta)


def decoder_layer_ref(dec_input, enc_output, params, n_head):
    p = params
    x = _mha_ref(dec_input, dec_input, p["slf_wq"], p["slf_wk"], p["slf_wv"],
                 p["slf_wo"], p["slf_g"], p["slf_b"], n_head)
    x = _mha_ref(x, enc_output, p["enc_wq"], p["enc_wk"], p["enc_wv"],
                 p["enc_wo"], p["enc_g"], p["enc_b"], n_head)
    h = jnp.maximum(x @ p["ffn_w1"] + p["ffn_b1"], 0.0)
    y = h @ p["ffn_w2"] + p["ffn_b2"] + x
    return _layer_norm(y, p["ffn_g"], p["ffn_b"])


# ----------------------------- main ------------------------------------------

if __name__ == "__main__":
    B, Lq, Lk = 2, 16, 16
    d_model, n_head, d_inner = 32, 4, 64

    key = jax.random.PRNGKey(0)
    ks = jax.random.split(key, 16)

    def w(k, shape, scale=0.05):
        return (scale * jax.random.normal(k, shape)).astype(jnp.float32)

    params = {
        # self-attention
        "slf_wq": w(ks[0], (d_model, d_model)), "slf_wk": w(ks[1], (d_model, d_model)),
        "slf_wv": w(ks[2], (d_model, d_model)), "slf_wo": w(ks[3], (d_model, d_model)),
        "slf_g": jnp.ones((1, d_model), jnp.float32),
        "slf_b": jnp.zeros((1, d_model), jnp.float32),
        # encoder-decoder attention
        "enc_wq": w(ks[4], (d_model, d_model)), "enc_wk": w(ks[5], (d_model, d_model)),
        "enc_wv": w(ks[6], (d_model, d_model)), "enc_wo": w(ks[7], (d_model, d_model)),
        "enc_g": jnp.ones((1, d_model), jnp.float32),
        "enc_b": jnp.zeros((1, d_model), jnp.float32),
        # position-wise FFN
        "ffn_w1": w(ks[8], (d_model, d_inner)), "ffn_b1": w(ks[9], (1, d_inner)),
        "ffn_w2": w(ks[10], (d_inner, d_model)), "ffn_b2": w(ks[11], (1, d_model)),
        "ffn_g": jnp.ones((1, d_model), jnp.float32),
        "ffn_b": jnp.zeros((1, d_model), jnp.float32),
    }

    dec_input = jax.random.normal(ks[12], (B, Lq, d_model), jnp.float32)
    enc_output = jax.random.normal(ks[13], (B, Lk, d_model), jnp.float32)

    ref = decoder_layer_ref(dec_input, enc_output, params, n_head)

    # tile_q=8 so the (B, q-tile) grid, pl.when hoist and scratch reuse are all exercised.
    # 1) f32 compute path: exact-semantics check at tight tolerance.
    out_f32 = jax.block_until_ready(
        decoder_layer(dec_input, enc_output, params, n_head,
                      tile_q=8, compute_dtype=jnp.float32))
    assert out_f32.shape == (B, Lq, d_model)
    assert jnp.allclose(out_f32, ref, atol=1e-4, rtol=1e-4), "f32 path mismatch vs reference"

    # 2) bf16 matmul path (production MXU path, approx softmax reciprocal): looser tolerance.
    out_bf16 = jax.block_until_ready(
        decoder_layer(dec_input, enc_output, params, n_head,
                      tile_q=8, compute_dtype=jnp.bfloat16))
    assert out_bf16.shape == (B, Lq, d_model)
    assert jnp.allclose(out_bf16, ref, atol=2e-2, rtol=2e-2), "bf16 path mismatch vs reference"

    print("KERNEL_OK")
</pallas_src>

<mosaic_0001>
module attributes {stable_mosaic.version = 11 : i64} {
  func.func @decoder_layer_kernel(%arg0: i32, %arg1: i32, %arg2: memref<1x16x32xf32, #tpu.memory_space<vmem>>, %arg3: memref<1x16x32xf32, #tpu.memory_space<vmem>>, %arg4: memref<32x32xf32, #tpu.memory_space<vmem>>, %arg5: memref<32x64xf32, #tpu.memory_space<vmem>>, %arg6: memref<4x8x32xf32, #tpu.memory_space<vmem>>, %arg7: memref<1x32xf32, #tpu.memory_space<vmem>>, %arg8: memref<1x32xf32, #tpu.memory_space<vmem>>, %arg9: memref<32x32xf32, #tpu.memory_space<vmem>>, %arg10: memref<32x64xf32, #tpu.memory_space<vmem>>, %arg11: memref<4x8x32xf32, #tpu.memory_space<vmem>>, %arg12: memref<1x32xf32, #tpu.memory_space<vmem>>, %arg13: memref<1x32xf32, #tpu.memory_space<vmem>>, %arg14: memref<32x64xf32, #tpu.memory_space<vmem>>, %arg15: memref<1x64xf32, #tpu.memory_space<vmem>>, %arg16: memref<64x32xf32, #tpu.memory_space<vmem>>, %arg17: memref<1x32xf32, #tpu.memory_space<vmem>>, %arg18: memref<1x32xf32, #tpu.memory_space<vmem>>, %arg19: memref<1x32xf32, #tpu.memory_space<vmem>>, %arg20: memref<1x8x32xf32, #tpu.memory_space<vmem>>, %arg21: memref<4x16x8xf32, #tpu.memory_space<vmem>>, %arg22: memref<4x16x8xf32, #tpu.memory_space<vmem>>, %arg23: memref<4x16x8xf32, #tpu.memory_space<vmem>>, %arg24: memref<4x16x8xf32, #tpu.memory_space<vmem>>) attributes {dimension_semantics = [#tpu.dimension_semantics<parallel>, #tpu.dimension_semantics<arbitrary>], iteration_bounds = array<i64: 2, 2>, scalar_prefetch = 0 : i64, scratch_operands = 4 : i64, tpu.core_type = #tpu.core_type<tc>, window_params = [{transform_indices = @transform_0, window_bounds = array<i64: 1, 16, 32>}, {transform_indices = @transform_1, window_bounds = array<i64: 1, 16, 32>}, {pipeline_mode = #tpu.pipeline_mode<synchronous>, transform_indices = @transform_2, window_bounds = array<i64: 32, 32>}, {pipeline_mode = #tpu.pipeline_mode<synchronous>, transform_indices = @transform_3, window_bounds = array<i64: 32, 64>}, {pipeline_mode = #tpu.pipeline_mode<synchronous>, transform_indices = @transform_4, window_bounds = array<i64: 4, 8, 32>}, {pipeline_mode = #tpu.pipeline_mode<synchronous>, transform_indices = @transform_5, window_bounds = array<i64: 1, 32>}, {pipeline_mode = #tpu.pipeline_mode<synchronous>, transform_indices = @transform_6, window_bounds = array<i64: 1, 32>}, {pipeline_mode = #tpu.pipeline_mode<synchronous>, transform_indices = @transform_7, window_bounds = array<i64: 32, 32>}, {pipeline_mode = #tpu.pipeline_mode<synchronous>, transform_indices = @transform_8, window_bounds = array<i64: 32, 64>}, {pipeline_mode = #tpu.pipeline_mode<synchronous>, transform_indices = @transform_9, window_bounds = array<i64: 4, 8, 32>}, {pipeline_mode = #tpu.pipeline_mode<synchronous>, transform_indices = @transform_10, window_bounds = array<i64: 1, 32>}, {pipeline_mode = #tpu.pipeline_mode<synchronous>, transform_indices = @transform_11, window_bounds = array<i64: 1, 32>}, {pipeline_mode = #tpu.pipeline_mode<synchronous>, transform_indices = @transform_12, window_bounds = array<i64: 32, 64>}, {pipeline_mode = #tpu.pipeline_mode<synchronous>, transform_indices = @transform_13, window_bounds = array<i64: 1, 64>}, {pipeline_mode = #tpu.pipeline_mode<synchronous>, transform_indices = @transform_14, window_bounds = array<i64: 64, 32>}, {pipeline_mode = #tpu.pipeline_mode<synchronous>, transform_indices = @transform_15, window_bounds = array<i64: 1, 32>}, {pipeline_mode = #tpu.pipeline_mode<synchronous>, transform_indices = @transform_16, window_bounds = array<i64: 1, 32>}, {pipeline_mode = #tpu.pipeline_mode<synchronous>, transform_indices = @transform_17, window_bounds = array<i64: 1, 32>}, {transform_indices = @transform_18, window_bounds = array<i64: 1, 8, 32>}]} {
    %c0_i32 = arith.constant 0 : i32
    %0 = arith.cmpi eq, %arg1, %c0_i32 : i32
    %1 = arith.extui %0 : i1 to i32
    %c0_i32_0 = arith.constant 0 : i32
    %2 = arith.cmpi ne, %1, %c0_i32_0 : i32
    scf.if %2 {
      %c0_78 = arith.constant 0 : index
      %c0_79 = arith.constant 0 : index
      %c0_80 = arith.constant 0 : index
      %154 = vector.load %arg2[%c0_78, %c0_79, %c0_80] : memref<1x16x32xf32, #tpu.memory_space<vmem>>, vector<1x16x32xf32>
      %155 = vector.shape_cast %154 : vector<1x16x32xf32> to vector<16x32xf32>
      %c0_81 = arith.constant 0 : index
      %c0_82 = arith.constant 0 : index
      %156 = vector.load %arg5[%c0_81, %c0_82] : memref<32x64xf32, #tpu.memory_space<vmem>>, vector<32x64xf32>
      %cst_83 = arith.constant dense<0.000000e+00> : vector<16x64xf32>
      %157 = tpu.matmul %155, %156, %cst_83 {dimension_numbers = #tpu.dot_dimension_numbers<[1], [0], [0], [1], [0, 0, 1, 1], [], []>} : vector<16x32xf32>, vector<32x64xf32>, vector<16x64xf32> -> vector<16x64xf32>
      %158 = vector.extract_strided_slice %157 {offsets = [0, 0], sizes = [16, 32], strides = [1, 1]} : vector<16x64xf32> to vector<16x32xf32>
      %159 = vector.extract_strided_slice %158 {offsets = [0, 0], sizes = [16, 8], strides = [1, 1]} : vector<16x32xf32> to vector<16x8xf32>
      %160 = vector.extract_strided_slice %158 {offsets = [0, 8], sizes = [16, 8], strides = [1, 1]} : vector<16x32xf32> to vector<16x8xf32>
      %161 = vector.extract_strided_slice %158 {offsets = [0, 16], sizes = [16, 8], strides = [1, 1]} : vector<16x32xf32> to vector<16x8xf32>
      %162 = vector.extract_strided_slice %158 {offsets = [0, 24], sizes = [16, 8], strides = [1, 1]} : vector<16x32xf32> to vector<16x8xf32>
      %163 = vector.shape_cast %159 : vector<16x8xf32> to vector<1x16x8xf32>
      %164 = vector.shape_cast %160 : vector<16x8xf32> to vector<1x16x8xf32>
      %165 = vector.shape_cast %161 : vector<16x8xf32> to vector<1x16x8xf32>
      %166 = vector.shape_cast %162 : vector<16x8xf32> to vector<1x16x8xf32>
      %167 = tpu.concatenate %163, %164, %165, %166 in 0 : vector<1x16x8xf32>, vector<1x16x8xf32>, vector<1x16x8xf32>, vector<1x16x8xf32> -> vector<4x16x8xf32>
      %c0_84 = arith.constant 0 : index
      %c0_85 = arith.constant 0 : index
      %c0_86 = arith.constant 0 : index
      %168 = vector.load %arg21[%c0_84, %c0_85, %c0_86] : memref<4x16x8xf32, #tpu.memory_space<vmem>>, vector<4x16x8xf32>
      tpu.vector_store %arg21[%c0_84, %c0_85, %c0_86], %167 {strides = array<i32>} : memref<4x16x8xf32, #tpu.memory_space<vmem>>, vector<4x16x8xf32>,
      %169 = vector.extract_strided_slice %157 {offsets = [0, 32], sizes = [16, 32], strides = [1, 1]} : vector<16x64xf32> to vector<16x32xf32>
      %170 = vector.extract_strided_slice %169 {offsets = [0, 0], sizes = [16, 8], strides = [1, 1]} : vector<16x32xf32> to vector<16x8xf32>
      %171 = vector.extract_strided_slice %169 {offsets = [0, 8], sizes = [16, 8], strides = [1, 1]} : vector<16x32xf32> to vector<16x8xf32>
      %172 = vector.extract_strided_slice %169 {offsets = [0, 16], sizes = [16, 8], strides = [1, 1]} : vector<16x32xf32> to vector<16x8xf32>
      %173 = vector.extract_strided_slice %169 {offsets = [0, 24], sizes = [16, 8], strides = [1, 1]} : vector<16x32xf32> to vector<16x8xf32>
      %174 = vector.shape_cast %170 : vector<16x8xf32> to vector<1x16x8xf32>
      %175 = vector.shape_cast %171 : vector<16x8xf32> to vector<1x16x8xf32>
      %176 = vector.shape_cast %172 : vector<16x8xf32> to vector<1x16x8xf32>
      %177 = vector.shape_cast %173 : vector<16x8xf32> to vector<1x16x8xf32>
      %178 = tpu.concatenate %174, %175, %176, %177 in 0 : vector<1x16x8xf32>, vector<1x16x8xf32>, vector<1x16x8xf32>, vector<1x16x8xf32> -> vector<4x16x8xf32>
      %c0_87 = arith.constant 0 : index
      %c0_88 = arith.constant 0 : index
      %c0_89 = arith.constant 0 : index
      %179 = vector.load %arg22[%c0_87, %c0_88, %c0_89] : memref<4x16x8xf32, #tpu.memory_space<vmem>>, vector<4x16x8xf32>
      tpu.vector_store %arg22[%c0_87, %c0_88, %c0_89], %178 {strides = array<i32>} : memref<4x16x8xf32, #tpu.memory_space<vmem>>, vector<4x16x8xf32>,
      %c0_90 = arith.constant 0 : index
      %c0_91 = arith.constant 0 : index
      %c0_92 = arith.constant 0 : index
      %180 = vector.load %arg3[%c0_90, %c0_91, %c0_92] : memref<1x16x32xf32, #tpu.memory_space<vmem>>, vector<1x16x32xf32>
      %181 = vector.shape_cast %180 : vector<1x16x32xf32> to vector<16x32xf32>
      %c0_93 = arith.constant 0 : index
      %c0_94 = arith.constant 0 : index
      %182 = vector.load %arg10[%c0_93, %c0_94] : memref<32x64xf32, #tpu.memory_space<vmem>>, vector<32x64xf32>
      %cst_95 = arith.constant dense<0.000000e+00> : vector<16x64xf32>
      %183 = tpu.matmul %181, %182, %cst_95 {dimension_numbers = #tpu.dot_dimension_numbers<[1], [0], [0], [1], [0, 0, 1, 1], [], []>} : vector<16x32xf32>, vector<32x64xf32>, vector<16x64xf32> -> vector<16x64xf32>
      %184 = vector.extract_strided_slice %183 {offsets = [0, 0], sizes = [16, 32], strides = [1, 1]} : vector<16x64xf32> to vector<16x32xf32>
      %185 = vector.extract_strided_slice %184 {offsets = [0, 0], sizes = [16, 8], strides = [1, 1]} : vector<16x32xf32> to vector<16x8xf32>
      %186 = vector.extract_strided_slice %184 {offsets = [0, 8], sizes = [16, 8], strides = [1, 1]} : vector<16x32xf32> to vector<16x8xf32>
      %187 = vector.extract_strided_slice %184 {offsets = [0, 16], sizes = [16, 8], strides = [1, 1]} : vector<16x32xf32> to vector<16x8xf32>
      %188 = vector.extract_strided_slice %184 {offsets = [0, 24], sizes = [16, 8], strides = [1, 1]} : vector<16x32xf32> to vector<16x8xf32>
      %189 = vector.shape_cast %185 : vector<16x8xf32> to vector<1x16x8xf32>
      %190 = vector.shape_cast %186 : vector<16x8xf32> to vector<1x16x8xf32>
      %191 = vector.shape_cast %187 : vector<16x8xf32> to vector<1x16x8xf32>
      %192 = vector.shape_cast %188 : vector<16x8xf32> to vector<1x16x8xf32>
      %193 = tpu.concatenate %189, %190, %191, %192 in 0 : vector<1x16x8xf32>, vector<1x16x8xf32>, vector<1x16x8xf32>, vector<1x16x8xf32> -> vector<4x16x8xf32>
      %c0_96 = arith.constant 0 : index
      %c0_97 = arith.constant 0 : index
      %c0_98 = arith.constant 0 : index
      %194 = vector.load %arg23[%c0_96, %c0_97, %c0_98] : memref<4x16x8xf32, #tpu.memory_space<vmem>>, vector<4x16x8xf32>
      tpu.vector_store %arg23[%c0_96, %c0_97, %c0_98], %193 {strides = array<i32>} : memref<4x16x8xf32, #tpu.memory_space<vmem>>, vector<4x16x8xf32>,
      %195 = vector.extract_strided_slice %183 {offsets = [0, 32], sizes = [16, 32], strides = [1, 1]} : vector<16x64xf32> to vector<16x32xf32>
      %196 = vector.extract_strided_slice %195 {offsets = [0, 0], sizes = [16, 8], strides = [1, 1]} : vector<16x32xf32> to vector<16x8xf32>
      %197 = vector.extract_strided_slice %195 {offsets = [0, 8], sizes = [16, 8], strides = [1, 1]} : vector<16x32xf32> to vector<16x8xf32>
      %198 = vector.extract_strided_slice %195 {offsets = [0, 16], sizes = [16, 8], strides = [1, 1]} : vector<16x32xf32> to vector<16x8xf32>
      %199 = vector.extract_strided_slice %195 {offsets = [0, 24], sizes = [16, 8], strides = [1, 1]} : vector<16x32xf32> to vector<16x8xf32>
      %200 = vector.shape_cast %196 : vector<16x8xf32> to vector<1x16x8xf32>
      %201 = vector.shape_cast %197 : vector<16x8xf32> to vector<1x16x8xf32>
      %202 = vector.shape_cast %198 : vector<16x8xf32> to vector<1x16x8xf32>
      %203 = vector.shape_cast %199 : vector<16x8xf32> to vector<1x16x8xf32>
      %204 = tpu.concatenate %200, %201, %202, %203 in 0 : vector<1x16x8xf32>, vector<1x16x8xf32>, vector<1x16x8xf32>, vector<1x16x8xf32> -> vector<4x16x8xf32>
      %c0_99 = arith.constant 0 : index
      %c0_100 = arith.constant 0 : index
      %c0_101 = arith.constant 0 : index
      %205 = vector.load %arg24[%c0_99, %c0_100, %c0_101] : memref<4x16x8xf32, #tpu.memory_space<vmem>>, vector<4x16x8xf32>
      tpu.vector_store %arg24[%c0_99, %c0_100, %c0_101], %204 {strides = array<i32>} : memref<4x16x8xf32, #tpu.memory_space<vmem>>, vector<4x16x8xf32>,
    } else {
    }
    %c8_i32 = arith.constant 8 : i32
    %3 = arith.muli %arg1, %c8_i32 : i32
    %4 = tpu.assume_multiple %3, 8 : i32
    %c0 = arith.constant 0 : index
    %5 = arith.index_cast %4 : i32 to index
    %c0_1 = arith.constant 0 : index
    %6 = vector.load %arg2[%c0, %5, %c0_1] : memref<1x16x32xf32, #tpu.memory_space<vmem>>, vector<1x8x32xf32>
    %7 = vector.shape_cast %6 : vector<1x8x32xf32> to vector<8x32xf32>
    %c0_2 = arith.constant 0 : index
    %c0_3 = arith.constant 0 : index
    %8 = vector.load %arg4[%c0_2, %c0_3] : memref<32x32xf32, #tpu.memory_space<vmem>>, vector<32x32xf32>
    %cst = arith.constant dense<0.000000e+00> : vector<8x32xf32>
    %9 = tpu.matmul %7, %8, %cst {dimension_numbers = #tpu.dot_dimension_numbers<[1], [0], [0], [1], [0, 0, 1, 1], [], []>} : vector<8x32xf32>, vector<32x32xf32>, vector<8x32xf32> -> vector<8x32xf32>
    %c0_4 = arith.constant 0 : index
    %c0_5 = arith.constant 0 : index
    %c0_6 = arith.constant 0 : index
    %10 = vector.load %arg21[%c0_4, %c0_5, %c0_6] : memref<4x16x8xf32, #tpu.memory_space<vmem>>, vector<4x16x8xf32>
    %c0_7 = arith.constant 0 : index
    %c0_8 = arith.constant 0 : index
    %c0_9 = arith.constant 0 : index
    %11 = vector.load %arg22[%c0_7, %c0_8, %c0_9] : memref<4x16x8xf32, #tpu.memory_space<vmem>>, vector<4x16x8xf32>
    %c0_10 = arith.constant 0 : index
    %c0_11 = arith.constant 0 : index
    %c0_12 = arith.constant 0 : index
    %12 = vector.load %arg6[%c0_10, %c0_11, %c0_12] : memref<4x8x32xf32, #tpu.memory_space<vmem>>, vector<4x8x32xf32>
    %13 = vector.extract_strided_slice %9 {offsets = [0, 0], sizes = [8, 8], strides = [1, 1]} : vector<8x32xf32> to vector<8x8xf32>
    %14 = vector.extract_strided_slice %9 {offsets = [0, 8], sizes = [8, 8], strides = [1, 1]} : vector<8x32xf32> to vector<8x8xf32>
    %15 = vector.extract_strided_slice %9 {offsets = [0, 16], sizes = [8, 8], strides = [1, 1]} : vector<8x32xf32> to vector<8x8xf32>
    %16 = vector.extract_strided_slice %9 {offsets = [0, 24], sizes = [8, 8], strides = [1, 1]} : vector<8x32xf32> to vector<8x8xf32>
    %17 = vector.shape_cast %13 : vector<8x8xf32> to vector<1x8x8xf32>
    %18 = vector.shape_cast %14 : vector<8x8xf32> to vector<1x8x8xf32>
    %19 = vector.shape_cast %15 : vector<8x8xf32> to vector<1x8x8xf32>
    %20 = vector.shape_cast %16 : vector<8x8xf32> to vector<1x8x8xf32>
    %21 = tpu.concatenate %17, %18, %19, %20 in 0 : vector<1x8x8xf32>, vector<1x8x8xf32>, vector<1x8x8xf32>, vector<1x8x8xf32> -> vector<4x8x8xf32>
    "tpu.trace_start"() <{level = 10 : i32, message = "hqd,hkd->hqk"}> : () -> ()
    %cst_13 = arith.constant dense<0.000000e+00> : vector<4x8x16xf32>
    %22 = tpu.matmul %21, %10, %cst_13 {dimension_numbers = #tpu.dot_dimension_numbers<[2], [2], [1], [1], [0, 0, 0, 1, 1, 1], [0], [0]>} : vector<4x8x8xf32>, vector<4x16x8xf32>, vector<4x8x16xf32> -> vector<4x8x16xf32>
    "tpu.trace_stop"() : () -> ()
    %cst_14 = arith.constant dense<0xFF800000> : vector<4x8xf32>
    %23 = vector.multi_reduction <maximumf>, %22, %cst_14 [2] : vector<4x8x16xf32> to vector<4x8xf32>
    %24 = vector.shape_cast %23 : vector<4x8xf32> to vector<4x8x1xf32>
    %25 = vector.broadcast %24 : vector<4x8x1xf32> to vector<4x8x16xf32>
    %26 = arith.subf %22, %25 : vector<4x8x16xf32>
    %27 = math.exp %26 : vector<4x8x16xf32>
    %cst_15 = arith.constant dense<0.000000e+00> : vector<4x8xf32>
    %28 = vector.multi_reduction <add>, %27, %cst_15 [2] : vector<4x8x16xf32> to vector<4x8xf32>
    %29 = vector.shape_cast %28 : vector<4x8xf32> to vector<4x8x1xf32>
    "tpu.trace_start"() <{level = 10 : i32, message = "hqk,hkd->hqd"}> : () -> ()
    %cst_16 = arith.constant dense<0.000000e+00> : vector<4x8x8xf32>
    %30 = tpu.matmul %27, %11, %cst_16 {dimension_numbers = #tpu.dot_dimension_numbers<[2], [1], [1], [2], [0, 0, 0, 1, 1, 2], [0], [0]>} : vector<4x8x16xf32>, vector<4x16x8xf32>, vector<4x8x8xf32> -> vector<4x8x8xf32>
    "tpu.trace_stop"() : () -> ()
    %31 = tpu.reciprocal %29 : vector<4x8x1xf32> -> vector<4x8x1xf32>
    %32 = vector.broadcast %31 : vector<4x8x1xf32> to vector<4x8x8xf32>
    %33 = arith.mulf %30, %32 : vector<4x8x8xf32>
    "tpu.trace_start"() <{level = 10 : i32, message = "hqd,hdm->hqm"}> : () -> ()
    %cst_17 = arith.constant dense<0.000000e+00> : vector<4x8x32xf32>
    %34 = tpu.matmul %33, %12, %cst_17 {dimension_numbers = #tpu.dot_dimension_numbers<[2], [1], [1], [2], [0, 0, 0, 1, 1, 2], [0], [0]>} : vector<4x8x8xf32>, vector<4x8x32xf32>, vector<4x8x32xf32> -> vector<4x8x32xf32>
    "tpu.trace_stop"() : () -> ()
    %cst_18 = arith.constant dense<0.000000e+00> : vector<8x32xf32>
    %35 = vector.multi_reduction <add>, %34, %cst_18 [0] : vector<4x8x32xf32> to vector<8x32xf32>
    %36 = arith.addf %35, %7 : vector<8x32xf32>
    %c0_19 = arith.constant 0 : index
    %c0_20 = arith.constant 0 : index
    %37 = vector.load %arg7[%c0_19, %c0_20] : memref<1x32xf32, #tpu.memory_space<vmem>>, vector<1x32xf32>
    %c0_21 = arith.constant 0 : index
    %c0_22 = arith.constant 0 : index
    %38 = vector.load %arg8[%c0_21, %c0_22] : memref<1x32xf32, #tpu.memory_space<vmem>>, vector<1x32xf32>
    %cst_23 = arith.constant dense<0.000000e+00> : vector<8xf32>
    %39 = vector.multi_reduction <add>, %36, %cst_23 [1] : vector<8x32xf32> to vector<8xf32>
    %40 = vector.shape_cast %39 : vector<8xf32> to vector<8x1xf32>
    %cst_24 = arith.constant 3.200000e+01 : f32
    %41 = vector.broadcast %cst_24 : f32 to vector<8x1xf32>
    %42 = arith.divf %40, %41 : vector<8x1xf32>
    %43 = vector.broadcast %42 : vector<8x1xf32> to vector<8x32xf32>
    %44 = arith.subf %36, %43 : vector<8x32xf32>
    %45 = arith.mulf %44, %44 : vector<8x32xf32>
    %cst_25 = arith.constant dense<0.000000e+00> : vector<8xf32>
    %46 = vector.multi_reduction <add>, %45, %cst_25 [1] : vector<8x32xf32> to vector<8xf32>
    %47 = vector.shape_cast %46 : vector<8xf32> to vector<8x1xf32>
    %cst_26 = arith.constant 3.200000e+01 : f32
    %48 = vector.broadcast %cst_26 : f32 to vector<8x1xf32>
    %49 = arith.divf %47, %48 : vector<8x1xf32>
    %50 = vector.broadcast %42 : vector<8x1xf32> to vector<8x32xf32>
    %51 = arith.subf %36, %50 : vector<8x32xf32>
    %cst_27 = arith.constant 9.99999997E-7 : f32
    %52 = vector.broadcast %cst_27 : f32 to vector<8x1xf32>
    %53 = arith.addf %49, %52 : vector<8x1xf32>
    %54 = math.rsqrt %53 : vector<8x1xf32>
    %55 = vector.broadcast %54 : vector<8x1xf32> to vector<8x32xf32>
    %56 = arith.mulf %51, %55 : vector<8x32xf32>
    %57 = vector.broadcast %37 : vector<1x32xf32> to vector<8x32xf32>
    %58 = arith.mulf %56, %57 : vector<8x32xf32>
    %59 = vector.broadcast %38 : vector<1x32xf32> to vector<8x32xf32>
    %60 = arith.addf %58, %59 : vector<8x32xf32>
    %c0_28 = arith.constant 0 : index
    %c0_29 = arith.constant 0 : index
    %61 = vector.load %arg9[%c0_28, %c0_29] : memref<32x32xf32, #tpu.memory_space<vmem>>, vector<32x32xf32>
    %cst_30 = arith.constant dense<0.000000e+00> : vector<8x32xf32>
    %62 = tpu.matmul %60, %61, %cst_30 {dimension_numbers = #tpu.dot_dimension_numbers<[1], [0], [0], [1], [0, 0, 1, 1], [], []>} : vector<8x32xf32>, vector<32x32xf32>, vector<8x32xf32> -> vector<8x32xf32>
    %c0_31 = arith.constant 0 : index
    %c0_32 = arith.constant 0 : index
    %c0_33 = arith.constant 0 : index
    %63 = vector.load %arg23[%c0_31, %c0_32, %c0_33] : memref<4x16x8xf32, #tpu.memory_space<vmem>>, vector<4x16x8xf32>
    %c0_34 = arith.constant 0 : index
    %c0_35 = arith.constant 0 : index
    %c0_36 = arith.constant 0 : index
    %64 = vector.load %arg24[%c0_34, %c0_35, %c0_36] : memref<4x16x8xf32, #tpu.memory_space<vmem>>, vector<4x16x8xf32>
    %c0_37 = arith.constant 0 : index
    %c0_38 = arith.constant 0 : index
    %c0_39 = arith.constant 0 : index
    %65 = vector.load %arg11[%c0_37, %c0_38, %c0_39] : memref<4x8x32xf32, #tpu.memory_space<vmem>>, vector<4x8x32xf32>
    %66 = vector.extract_strided_slice %62 {offsets = [0, 0], sizes = [8, 8], strides = [1, 1]} : vector<8x32xf32> to vector<8x8xf32>
    %67 = vector.extract_strided_slice %62 {offsets = [0, 8], sizes = [8, 8], strides = [1, 1]} : vector<8x32xf32> to vector<8x8xf32>
    %68 = vector.extract_strided_slice %62 {offsets = [0, 16], sizes = [8, 8], strides = [1, 1]} : vector<8x32xf32> to vector<8x8xf32>
    %69 = vector.extract_strided_slice %62 {offsets = [0, 24], sizes = [8, 8], strides = [1, 1]} : vector<8x32xf32> to vector<8x8xf32>
    %70 = vector.shape_cast %66 : vector<8x8xf32> to vector<1x8x8xf32>
    %71 = vector.shape_cast %67 : vector<8x8xf32> to vector<1x8x8xf32>
    %72 = vector.shape_cast %68 : vector<8x8xf32> to vector<1x8x8xf32>
    %73 = vector.shape_cast %69 : vector<8x8xf32> to vector<1x8x8xf32>
    %74 = tpu.concatenate %70, %71, %72, %73 in 0 : vector<1x8x8xf32>, vector<1x8x8xf32>, vector<1x8x8xf32>, vector<1x8x8xf32> -> vector<4x8x8xf32>
    "tpu.trace_start"() <{level = 10 : i32, message = "hqd,hkd->hqk"}> : () -> ()
    %cst_40 = arith.constant dense<0.000000e+00> : vector<4x8x16xf32>
    %75 = tpu.matmul %74, %63, %cst_40 {dimension_numbers = #tpu.dot_dimension_numbers<[2], [2], [1], [1], [0, 0, 0, 1, 1, 1], [0], [0]>} : vector<4x8x8xf32>, vector<4x16x8xf32>, vector<4x8x16xf32> -> vector<4x8x16xf32>
    "tpu.trace_stop"() : () -> ()
    %cst_41 = arith.constant dense<0xFF800000> : vector<4x8xf32>
    %76 = vector.multi_reduction <maximumf>, %75, %cst_41 [2] : vector<4x8x16xf32> to vector<4x8xf32>
    %77 = vector.shape_cast %76 : vector<4x8xf32> to vector<4x8x1xf32>
    %78 = vector.broadcast %77 : vector<4x8x1xf32> to vector<4x8x16xf32>
    %79 = arith.subf %75, %78 : vector<4x8x16xf32>
    %80 = math.exp %79 : vector<4x8x16xf32>
    %cst_42 = arith.constant dense<0.000000e+00> : vector<4x8xf32>
    %81 = vector.multi_reduction <add>, %80, %cst_42 [2] : vector<4x8x16xf32> to vector<4x8xf32>
    %82 = vector.shape_cast %81 : vector<4x8xf32> to vector<4x8x1xf32>
    "tpu.trace_start"() <{level = 10 : i32, message = "hqk,hkd->hqd"}> : () -> ()
    %cst_43 = arith.constant dense<0.000000e+00> : vector<4x8x8xf32>
    %83 = tpu.matmul %80, %64, %cst_43 {dimension_numbers = #tpu.dot_dimension_numbers<[2], [1], [1], [2], [0, 0, 0, 1, 1, 2], [0], [0]>} : vector<4x8x16xf32>, vector<4x16x8xf32>, vector<4x8x8xf32> -> vector<4x8x8xf32>
    "tpu.trace_stop"() : () -> ()
    %84 = tpu.reciprocal %82 : vector<4x8x1xf32> -> vector<4x8x1xf32>
    %85 = vector.broadcast %84 : vector<4x8x1xf32> to vector<4x8x8xf32>
    %86 = arith.mulf %83, %85 : vector<4x8x8xf32>
    "tpu.trace_start"() <{level = 10 : i32, message = "hqd,hdm->hqm"}> : () -> ()
    %cst_44 = arith.constant dense<0.000000e+00> : vector<4x8x32xf32>
    %87 = tpu.matmul %86, %65, %cst_44 {dimension_numbers = #tpu.dot_dimension_numbers<[2], [1], [1], [2], [0, 0, 0, 1, 1, 2], [0], [0]>} : vector<4x8x8xf32>, vector<4x8x32xf32>, vector<4x8x32xf32> -> vector<4x8x32xf32>
    "tpu.trace_stop"() : () -> ()
    %cst_45 = arith.constant dense<0.000000e+00> : vector<8x32xf32>
    %88 = vector.multi_reduction <add>, %87, %cst_45 [0] : vector<4x8x32xf32> to vector<8x32xf32>
    %89 = arith.addf %88, %60 : vector<8x32xf32>
    %c0_46 = arith.constant 0 : index
    %c0_47 = arith.constant 0 : index
    %90 = vector.load %arg12[%c0_46, %c0_47] : memref<1x32xf32, #tpu.memory_space<vmem>>, vector<1x32xf32>
    %c0_48 = arith.constant 0 : index
    %c0_49 = arith.constant 0 : index
    %91 = vector.load %arg13[%c0_48, %c0_49] : memref<1x32xf32, #tpu.memory_space<vmem>>, vector<1x32xf32>
    %cst_50 = arith.constant dense<0.000000e+00> : vector<8xf32>
    %92 = vector.multi_reduction <add>, %89, %cst_50 [1] : vector<8x32xf32> to vector<8xf32>
    %93 = vector.shape_cast %92 : vector<8xf32> to vector<8x1xf32>
    %cst_51 = arith.constant 3.200000e+01 : f32
    %94 = vector.broadcast %cst_51 : f32 to vector<8x1xf32>
    %95 = arith.divf %93, %94 : vector<8x1xf32>
    %96 = vector.broadcast %95 : vector<8x1xf32> to vector<8x32xf32>
    %97 = arith.subf %89, %96 : vector<8x32xf32>
    %98 = arith.mulf %97, %97 : vector<8x32xf32>
    %cst_52 = arith.constant dense<0.000000e+00> : vector<8xf32>
    %99 = vector.multi_reduction <add>, %98, %cst_52 [1] : vector<8x32xf32> to vector<8xf32>
    %100 = vector.shape_cast %99 : vector<8xf32> to vector<8x1xf32>
    %cst_53 = arith.constant 3.200000e+01 : f32
    %101 = vector.broadcast %cst_53 : f32 to vector<8x1xf32>
    %102 = arith.divf %100, %101 : vector<8x1xf32>
    %103 = vector.broadcast %95 : vector<8x1xf32> to vector<8x32xf32>
    %104 = arith.subf %89, %103 : vector<8x32xf32>
    %cst_54 = arith.constant 9.99999997E-7 : f32
    %105 = vector.broadcast %cst_54 : f32 to vector<8x1xf32>
    %106 = arith.addf %102, %105 : vector<8x1xf32>
    %107 = math.rsqrt %106 : vector<8x1xf32>
    %108 = vector.broadcast %107 : vector<8x1xf32> to vector<8x32xf32>
    %109 = arith.mulf %104, %108 : vector<8x32xf32>
    %110 = vector.broadcast %90 : vector<1x32xf32> to vector<8x32xf32>
    %111 = arith.mulf %109, %110 : vector<8x32xf32>
    %112 = vector.broadcast %91 : vector<1x32xf32> to vector<8x32xf32>
    %113 = arith.addf %111, %112 : vector<8x32xf32>
    %c0_55 = arith.constant 0 : index
    %c0_56 = arith.constant 0 : index
    %114 = vector.load %arg14[%c0_55, %c0_56] : memref<32x64xf32, #tpu.memory_space<vmem>>, vector<32x64xf32>
    %cst_57 = arith.constant dense<0.000000e+00> : vector<8x64xf32>
    %115 = tpu.matmul %113, %114, %cst_57 {dimension_numbers = #tpu.dot_dimension_numbers<[1], [0], [0], [1], [0, 0, 1, 1], [], []>} : vector<8x32xf32>, vector<32x64xf32>, vector<8x64xf32> -> vector<8x64xf32>
    %c0_58 = arith.constant 0 : index
    %c0_59 = arith.constant 0 : index
    %116 = vector.load %arg15[%c0_58, %c0_59] : memref<1x64xf32, #tpu.memory_space<vmem>>, vector<1x64xf32>
    %117 = vector.broadcast %116 : vector<1x64xf32> to vector<8x64xf32>
    %118 = arith.addf %115, %117 : vector<8x64xf32>
    %cst_60 = arith.constant 0.000000e+00 : f32
    %119 = vector.broadcast %cst_60 : f32 to vector<8x64xf32>
    %120 = arith.maximumf %118, %119 : vector<8x64xf32>
    %c0_61 = arith.constant 0 : index
    %c0_62 = arith.constant 0 : index
    %121 = vector.load %arg16[%c0_61, %c0_62] : memref<64x32xf32, #tpu.memory_space<vmem>>, vector<64x32xf32>
    %cst_63 = arith.constant dense<0.000000e+00> : vector<8x32xf32>
    %122 = tpu.matmul %120, %121, %cst_63 {dimension_numbers = #tpu.dot_dimension_numbers<[1], [0], [0], [1], [0, 0, 1, 1], [], []>} : vector<8x64xf32>, vector<64x32xf32>, vector<8x32xf32> -> vector<8x32xf32>
    %c0_64 = arith.constant 0 : index
    %c0_65 = arith.constant 0 : index
    %123 = vector.load %arg17[%c0_64, %c0_65] : memref<1x32xf32, #tpu.memory_space<vmem>>, vector<1x32xf32>
    %124 = vector.broadcast %123 : vector<1x32xf32> to vector<8x32xf32>
    %125 = arith.addf %122, %124 : vector<8x32xf32>
    %126 = arith.addf %125, %113 : vector<8x32xf32>
    %c0_66 = arith.constant 0 : index
    %c0_67 = arith.constant 0 : index
    %127 = vector.load %arg18[%c0_66, %c0_67] : memref<1x32xf32, #tpu.memory_space<vmem>>, vector<1x32xf32>
    %c0_68 = arith.constant 0 : index
    %c0_69 = arith.constant 0 : index
    %128 = vector.load %arg19[%c0_68, %c0_69] : memref<1x32xf32, #tpu.memory_space<vmem>>, vector<1x32xf32>
    %cst_70 = arith.constant dense<0.000000e+00> : vector<8xf32>
    %129 = vector.multi_reduction <add>, %126, %cst_70 [1] : vector<8x32xf32> to vector<8xf32>
    %130 = vector.shape_cast %129 : vector<8xf32> to vector<8x1xf32>
    %cst_71 = arith.constant 3.200000e+01 : f32
    %131 = vector.broadcast %cst_71 : f32 to vector<8x1xf32>
    %132 = arith.divf %130, %131 : vector<8x1xf32>
    %133 = vector.broadcast %132 : vector<8x1xf32> to vector<8x32xf32>
    %134 = arith.subf %126, %133 : vector<8x32xf32>
    %135 = arith.mulf %134, %134 : vector<8x32xf32>
    %cst_72 = arith.constant dense<0.000000e+00> : vector<8xf32>
    %136 = vector.multi_reduction <add>, %135, %cst_72 [1] : vector<8x32xf32> to vector<8xf32>
    %137 = vector.shape_cast %136 : vector<8xf32> to vector<8x1xf32>
    %cst_73 = arith.constant 3.200000e+01 : f32
    %138 = vector.broadcast %cst_73 : f32 to vector<8x1xf32>
    %139 = arith.divf %137, %138 : vector<8x1xf32>
    %140 = vector.broadcast %132 : vector<8x1xf32> to vector<8x32xf32>
    %141 = arith.subf %126, %140 : vector<8x32xf32>
    %cst_74 = arith.constant 9.99999997E-7 : f32
    %142 = vector.broadcast %cst_74 : f32 to vector<8x1xf32>
    %143 = arith.addf %139, %142 : vector<8x1xf32>
    %144 = math.rsqrt %143 : vector<8x1xf32>
    %145 = vector.broadcast %144 : vector<8x1xf32> to vector<8x32xf32>
    %146 = arith.mulf %141, %145 : vector<8x32xf32>
    %147 = vector.broadcast %127 : vector<1x32xf32> to vector<8x32xf32>
    %148 = arith.mulf %146, %147 : vector<8x32xf32>
    %149 = vector.broadcast %128 : vector<1x32xf32> to vector<8x32xf32>
    %150 = arith.addf %148, %149 : vector<8x32xf32>
    %c0_75 = arith.constant 0 : index
    %c0_76 = arith.constant 0 : index
    %c0_77 = arith.constant 0 : index
    %151 = vector.load %arg20[%c0_75, %c0_76, %c0_77] : memref<1x8x32xf32, #tpu.memory_space<vmem>>, vector<1x8x32xf32>
    %152 = vector.shape_cast %151 : vector<1x8x32xf32> to vector<8x32xf32>
    %153 = vector.shape_cast %150 : vector<8x32xf32> to vector<1x8x32xf32>
    tpu.vector_store %arg20[%c0_75, %c0_76, %c0_77], %153 {strides = array<i32>} : memref<1x8x32xf32, #tpu.memory_space<vmem>>, vector<1x8x32xf32>,
    return
  }
  func.func @transform_0(%arg0: i32, %arg1: i32) -> (i32, i32, i32) {
    %c0_i32 = arith.constant 0 : i32
    %c0_i32_0 = arith.constant 0 : i32
    %c0_i32_1 = arith.constant 0 : i32
    return %arg0, %c0_i32, %c0_i32_0 : i32, i32, i32
  }
  func.func @transform_1(%arg0: i32, %arg1: i32) -> (i32, i32, i32) {
    %c0_i32 = arith.constant 0 : i32
    %c0_i32_0 = arith.constant 0 : i32
    %c0_i32_1 = arith.constant 0 : i32
    return %arg0, %c0_i32, %c0_i32_0 : i32, i32, i32
  }
  func.func @transform_2(%arg0: i32, %arg1: i32) -> (i32, i32) {
    %c0_i32 = arith.constant 0 : i32
    %c0_i32_0 = arith.constant 0 : i32
    %c0_i32_1 = arith.constant 0 : i32
    return %c0_i32, %c0_i32_0 : i32, i32
  }
  func.func @transform_3(%arg0: i32, %arg1: i32) -> (i32, i32) {
    %c0_i32 = arith.constant 0 : i32
    %c0_i32_0 = arith.constant 0 : i32
    %c0_i32_1 = arith.constant 0 : i32
    return %c0_i32, %c0_i32_0 : i32, i32
  }
  func.func @transform_4(%arg0: i32, %arg1: i32) -> (i32, i32, i32) {
    %c0_i32 = arith.constant 0 : i32
    %c0_i32_0 = arith.constant 0 : i32
    %c0_i32_1 = arith.constant 0 : i32
    %c0_i32_2 = arith.constant 0 : i32
    return %c0_i32, %c0_i32_0, %c0_i32_1 : i32, i32, i32
  }
  func.func @transform_5(%arg0: i32, %arg1: i32) -> (i32, i32) {
    %c0_i32 = arith.constant 0 : i32
    %c0_i32_0 = arith.constant 0 : i32
    %c0_i32_1 = arith.constant 0 : i32
    return %c0_i32, %c0_i32_0 : i32, i32
  }
  func.func @transform_6(%arg0: i32, %arg1: i32) -> (i32, i32) {
    %c0_i32 = arith.constant 0 : i32
    %c0_i32_0 = arith.constant 0 : i32
    %c0_i32_1 = arith.constant 0 : i32
    return %c0_i32, %c0_i32_0 : i32, i32
  }
  func.func @transform_7(%arg0: i32, %arg1: i32) -> (i32, i32) {
    %c0_i32 = arith.constant 0 : i32
    %c0_i32_0 = arith.constant 0 : i32
    %c0_i32_1 = arith.constant 0 : i32
    return %c0_i32, %c0_i32_0 : i32, i32
  }
  func.func @transform_8(%arg0: i32, %arg1: i32) -> (i32, i32) {
    %c0_i32 = arith.constant 0 : i32
    %c0_i32_0 = arith.constant 0 : i32
    %c0_i32_1 = arith.constant 0 : i32
    return %c0_i32, %c0_i32_0 : i32, i32
  }
  func.func @transform_9(%arg0: i32, %arg1: i32) -> (i32, i32, i32) {
    %c0_i32 = arith.constant 0 : i32
    %c0_i32_0 = arith.constant 0 : i32
    %c0_i32_1 = arith.constant 0 : i32
    %c0_i32_2 = arith.constant 0 : i32
    return %c0_i32, %c0_i32_0, %c0_i32_1 : i32, i32, i32
  }
  func.func @transform_10(%arg0: i32, %arg1: i32) -> (i32, i32) {
    %c0_i32 = arith.constant 0 : i32
    %c0_i32_0 = arith.constant 0 : i32
    %c0_i32_1 = arith.constant 0 : i32
    return %c0_i32, %c0_i32_0 : i32, i32
  }
  func.func @transform_11(%arg0: i32, %arg1: i32) -> (i32, i32) {
    %c0_i32 = arith.constant 0 : i32
    %c0_i32_0 = arith.constant 0 : i32
    %c0_i32_1 = arith.constant 0 : i32
    return %c0_i32, %c0_i32_0 : i32, i32
  }
  func.func @transform_12(%arg0: i32, %arg1: i32) -> (i32, i32) {
    %c0_i32 = arith.constant 0 : i32
    %c0_i32_0 = arith.constant 0 : i32
    %c0_i32_1 = arith.constant 0 : i32
    return %c0_i32, %c0_i32_0 : i32, i32
  }
  func.func @transform_13(%arg0: i32, %arg1: i32) -> (i32, i32) {
    %c0_i32 = arith.constant 0 : i32
    %c0_i32_0 = arith.constant 0 : i32
    %c0_i32_1 = arith.constant 0 : i32
    return %c0_i32, %c0_i32_0 : i32, i32
  }
  func.func @transform_14(%arg0: i32, %arg1: i32) -> (i32, i32) {
    %c0_i32 = arith.constant 0 : i32
    %c0_i32_0 = arith.constant 0 : i32
    %c0_i32_1 = arith.constant 0 : i32
    return %c0_i32, %c0_i32_0 : i32, i32
  }
  func.func @transform_15(%arg0: i32, %arg1: i32) -> (i32, i32) {
    %c0_i32 = arith.constant 0 : i32
    %c0_i32_0 = arith.constant 0 : i32
    %c0_i32_1 = arith.constant 0 : i32
    return %c0_i32, %c0_i32_0 : i32, i32
  }
  func.func @transform_16(%arg0: i32, %arg1: i32) -> (i32, i32) {
    %c0_i32 = arith.constant 0 : i32
    %c0_i32_0 = arith.constant 0 : i32
    %c0_i32_1 = arith.constant 0 : i32
    return %c0_i32, %c0_i32_0 : i32, i32
  }
  func.func @transform_17(%arg0: i32, %arg1: i32) -> (i32, i32) {
    %c0_i32 = arith.constant 0 : i32
    %c0_i32_0 = arith.constant 0 : i32
    %c0_i32_1 = arith.constant 0 : i32
    return %c0_i32, %c0_i32_0 : i32, i32
  }
  func.func @transform_18(%arg0: i32, %arg1: i32) -> (i32, i32, i32) {
    %c0_i32 = arith.constant 0 : i32
    %c0_i32_0 = arith.constant 0 : i32
    return %arg0, %arg1, %c0_i32 : i32, i32, i32
  }
}

</mosaic_0001>

<bundles_post_ra>
// kernel: tpu_custom_call.1
= control target key start
LH: loop header
LB: loop body
LE: loop exit
PB: predicated region body
PF: predicated region fallthrough
CT: control target
= control target key end

     0   :  { %s5241_s0 = inlined_call_operand.vmem [shape: f32[2,16,32], index: 0, kind: input, shape index: {}]   ;;  %s5242_s1 = inlined_call_operand.vmem [shape: f32[2,16,32], index: 1, kind: input, shape index: {}]   ;;  %s5243_s2 = inlined_call_operand.vmem [shape: f32[32,32], index: 2, kind: input, shape index: {}]   ;;  %s5244_s3 = inlined_call_operand.hbm [shape: f32[32,64], index: 3, kind: input, shape index: {}]   ;;  %s5245_s4 = inlined_call_operand.hbm [shape: f32[4,8,32], index: 4, kind: input, shape index: {}]   ;;  %s5246_s5 = inlined_call_operand.vmem [shape: f32[1,32], index: 5, kind: input, shape index: {}]   ;;  %s5247_s6 = inlined_call_operand.vmem [shape: f32[1,32], index: 6, kind: input, shape index: {}]   ;;  %s5248_s7 = inlined_call_operand.hbm [shape: f32[32,32], index: 7, kind: input, shape index: {}]   ;;  %s5249_s8 = inlined_call_operand.hbm [shape: f32[32,64], index: 8, kind: input, shape index: {}]   ;;  %s5250_s9 = inlined_call_operand.hbm [shape: f32[4,8,32], index: 9, kind: input, shape index: {}]   ;;  %s5251_s10 = inlined_call_operand.vmem [shape: f32[1,32], index: 10, kind: input, shape index: {}]   ;;  %s5252_s11 = inlined_call_operand.vmem [shape: f32[1,32], index: 11, kind: input, shape index: {}]   ;;  %s5253_s12 = inlined_call_operand.hbm [shape: f32[32,64], index: 12, kind: input, shape index: {}]   ;;  %s5254_s13 = inlined_call_operand.vmem [shape: f32[1,64], index: 13, kind: input, shape index: {}]   ;;  %s5255_s14 = inlined_call_operand.vmem [shape: f32[64,32], index: 14, kind: input, shape index: {}]   ;;  %s5256_s15 = inlined_call_operand.vmem [shape: f32[1,32], index: 15, kind: input, shape index: {}]   ;;  %s5257_s16 = inlined_call_operand.vmem [shape: f32[1,32], index: 16, kind: input, shape index: {}]   ;;  %s5258_s17 = inlined_call_operand.vmem [shape: f32[1,32], index: 17, kind: input, shape index: {}]   ;;  %s5259_s18 = inlined_call_operand.hbm [shape: f32[2,16,32], index: 18, kind: output, shape index: {}]  }
   0x1   :  { %5277 = sst [smem:[#allocation33_spill]] %s5241_s0 }
   0x2   :  { %5278 = sst [smem:[#allocation34_spill]] %s5242_s1 }
   0x3   :  { %5279 = sst [smem:[#allocation35_spill]] %s5243_s2 }
   0x4   :  { %5280 = sst [smem:[#allocation36_spill]] %s5245_s4 }
   0x5   :  { %5281 = sst [smem:[#allocation37_spill]] %s5252_s11 }
   0x6   :  { %5282 = sst [smem:[#allocation38_spill]] %s5254_s13 }
   0x7   :  { %5283 = sst [smem:[#allocation39_spill]] %s5256_s15 }
   0x8   :  { %5284 = sst [smem:[#allocation40_spill]] %s5257_s16 }
   0x9   :  { %5285 = sst [smem:[#allocation41_spill]] %s5258_s17 }
   0xa   :  { %5286 = sst [smem:[#allocation42_spill]] %s5259_s18 }
   0xb   :  { %23 = vsyncpa [#allocation7], 0 }
   0xc   :  { %24 = vsyncpa [#allocation10], 0 }
   0xd   :  { %25 = vsyncpa [#allocation13], 0 }
   0xe   :  { %26 = vsyncpa [#allocation16], 0 }
   0xf   :  { %27 = vsyncpa [#allocation8], 0 }
  0x10   :  { %29 = vsyncpa [#allocation8 + $0x1], 0  ;;  %s4623_s27 = smov 0   ;;  %s4625_s28 = smov 0  }
  0x11   :  { %s4627_s29 = smov 0   ;;  %s4629_s30 = smov 0  }
  0x12   :  { %s4631_s0 = smov 0   ;;  %s4633_s19 = smov 0  }
  0x13   :  { %s4635_s1 = smov 0   ;;  %s4637_s20 = smov 0  }
  0x14 LB: > { %5287 = sst [smem:[#allocation23_spill]] %s4479_s27  ;;  %s3532_s21 = sadd.s32 4294967295, %s4507_s20   ;;  %s4507_s20 = sphi %s4637_s20, %s35_s20   ;;  %s4503_s1 = sphi %s4635_s1, %s5329_s1   ;;  %s4499_s19 = sphi %s4633_s19, %s5328_s19   ;;  %s4495_s0 = sphi %s4631_s0, %s5327_s0   ;;  %s4491_s30 = sphi %s4629_s30, %s5326_s30   ;;  %s4487_s29 = sphi %s4627_s29, %s5325_s29   ;;  %s4483_s28 = sphi %s4625_s28, %s5331_s28   ;;  %s4479_s27 = sphi %s4623_s27, %s5330_s27  }
  0x15   : > { %5288 = sst [smem:[#allocation24_spill]] %s4487_s29  ;;  %s3533_s22 = sadd.s32 4294967294, %s4507_s20  }
  0x16   : > { %5289 = sst [smem:[#allocation25_spill]] %s4499_s19  ;;  %s44_s2 = sadd.s32 1, %s4499_s19 }
  0x17   : > { %5290 = sst [smem:[#allocation26_spill]] %s4503_s1  ;;  %s47_s23 = sadd.s32 1, %s4503_s1 }
  0x18   : > { %5291 = sst [smem:[#allocation27_spill]] %s4507_s20  ;;  %p45_p0 = scmp.ge.s32.totalorder %s44_s2, 2 }
  0x19   : > { %s444_s24 = sadd.s32 1, %s4487_s29  ;;  %p454_p1 = scmp.ne.s32.totalorder %s4487_s29, %s4483_s28 }
  0x1a   : > { %p455_p2 = scmp.eq.s32.totalorder %s3532_s21, 3  ;;  %s5333_s2 = smov (%p45_p0, %s44_s2), 0 }
  0x1b   : > { %5292 = sst [smem:[#allocation28_spill]] %s5333_s2  ;;  %s5335_s23 = smov (!%p45_p0, %s47_s23), %s4503_s1 }
  0x1c   : > { %s440_s25 = ssub.s32 %s4499_s19, %s5333_s2  ;;  %p4675_p3 = por %p455_p2, %p454_p1 }
  0x1d   : > { %p49_p4 = scmp.ge.s32.totalorder %s5335_s23, 2  ;;  %p460_p5 = scmp.ne.s32.totalorder %s4483_s28, %s4479_s27 }
  0x1e   : > { %s5293_s26 = scalar_select %p4675_p3, 1, 0 }
  0x1f   : > { %p461_p6 = scmp.eq.s32.totalorder %s3533_s22, 3  ;;  %p3534_p7 = scmp.ge.s32.totalorder %s4507_s20, 1 }
  0x20   : > { %5294 = sst [smem:[#allocation29_spill]] %s5293_s26  ;;  %s5337_s23 = smov (%p49_p4, %s5335_s23), 0 }
  0x21   : > { %5295 = sst [smem:[#allocation30_spill]] %s5337_s23  ;;  %p4684_p8 = por %p461_p6, %p460_p5 }
  0x22   : > { %p468_p9 = scmp.lt.s32.totalorder %s4507_s20, 5  ;;  %s439_s17 = ssub.s32 %s4503_s1, %s5337_s23 }
  0x23   : > { %s5296_s18 = scalar_select %p4684_p8, 1, 0 }
  0x24   : > { %s441_s16 = sor.u32 %s440_s25, %s439_s17  ;;  %p4691_p10 = pnand %p3534_p7, %p468_p9 }
  0x25   : > { %5297 = sst [smem:[#allocation31_spill]] %s5296_s18  ;;  %p442_p11 = scmp.eq.s32.totalorder %s441_s16, 0 }
  0x26   : > { %s5298_s2 = scalar_select %p4691_p10, 1, 0 }
  0x27   : > { %p4695_p12 = scmp.eq.s32.totalorder %s3532_s21, 0  ;;  %p4073_p13 = pneg %p4691_p10 }
  0x28   : > { %s4702_s22 = scalar_select %p442_p11, %s4487_s29, %s444_s24  }
  0x29   : > { %s5299_s19 = scalar_select %p4695_p12, 1, 0 }
  0x2a   : > { %5300 = sst [smem:[#allocation32_spill]] %s4702_s22  ;;  %p4706_p0 = pnand %p4695_p12, %p4073_p13 }
  0x2b   : > { %s4509_s17 = smov [#allocation9]   ;;  %s4510_s23 = smov [#allocation12]  }
  0x2c   : > { %s496_s25 = sshll.u32 %s4509_s17, 4  ;;  %s528_s16 = sshll.u32 %s4510_s23, 4  ;;  %s497_s25 = int_to_ptr.vmem [resolvable:$true] %s496_s25  ;;  %s529_s16 = int_to_ptr.vmem [resolvable:$true] %s528_s16 }
  0x2d   : > { %s5302_s4 = sld [smem:[#allocation36_spill]]  ;;  %p4718_p2 = pneg %p4706_p0 }
  0x33   : > { %s4229_s27 = scalar_lea.hbm %s5302_s4, 512 }
  0x34   : > { %p4230_p1 = scmp.ne.s32.totalorder %s5302_s4, %s4229_s27  ;;  %p4236_p6 = scmp.lt.u32.totalorder %s4229_s27, %s5302_s4 }
  0x36   : > { %p4232_p4 = pnand %p4718_p2, %p4230_p1 }
  0x38   : > { %p4233_p5 = pneg %p4232_p4 }
  0x3a   : > { %p4238_p7 = pnand %p4236_p6, %p4233_p5 }
  0x3c   : > { %4241 = shalt.err (!%p4238_p7)
}
  0x3d   : > { %s4242_s1 = scalar_lea.vmem %s497_s25, 512  ;;  %p4250_p8 = scmp.lt.s32.totalorder %s497_s25, %s497_s25 }
  0x3e   : > { %p4243_p9 = scmp.ne.s32.totalorder %s497_s25, %s4242_s1  ;;  %p4251_p3 = scmp.lt.s32.totalorder %s4242_s1, %s4242_s1 }
  0x40   : > { %p4245_p11 = pnand %p4243_p9, %p4718_p2  ;;  %p4252_p12 = por %p4251_p3, %p4250_p8 }
  0x42   : > { %p4246_p13 = pneg %p4245_p11 }
  0x44   : > { %p4253_p10 = pnand %p4252_p12, %p4246_p13 }
  0x46   : > { %4256 = shalt.err (!%p4253_p10)
}
  0x47   : > { %s4511_s20 = smov 128   ;;  %s4512_s23 = smov 8  }
  0x48   : > { %4079 = dma.hbm_to_vmem [thread:$0]  (!%p4706_p0), %s5302_s4, 512, %s497_s25, [#allocation10], %s4511_s20, %s4511_s20, %s4512_s23  }
  0x49   : > { %s4257_s17 = scalar_lea.hbm %s5249_s8, 512 }
  0x4a   : > { %p4258_p3 = scmp.ne.s32.totalorder %s5249_s8, %s4257_s17  ;;  %p4264_p12 = scmp.lt.u32.totalorder %s4257_s17, %s5249_s8 }
  0x4c   : > { %p4260_p8 = pnand %p4258_p3, %p4718_p2 }
  0x4e   : > { %p4261_p10 = pneg %p4260_p8 }
  0x50   : > { %p4266_p1 = pnand %p4264_p12, %p4261_p10 }
  0x52   : > { %4269 = shalt.err (!%p4266_p1)
}
  0x53   : > { %s4270_s27 = scalar_lea.vmem %s529_s16, 512  ;;  %p4278_p7 = scmp.lt.s32.totalorder %s529_s16, %s529_s16 }
  0x54   : > { %p4271_p4 = scmp.ne.s32.totalorder %s529_s16, %s4270_s27  ;;  %p4279_p9 = scmp.lt.s32.totalorder %s4270_s27, %s4270_s27 }
  0x56   : > { %p4273_p5 = pnand %p4271_p4, %p4718_p2  ;;  %p4280_p11 = por %p4279_p9, %p4278_p7 }
  0x58   : > { %p4274_p6 = pneg %p4273_p5 }
  0x5a   : > { %p4281_p13 = pnand %p4280_p11, %p4274_p6 }
  0x5c   : > { %4284 = shalt.err (!%p4281_p13)
}
  0x5d   : > { %4085 = dma.hbm_to_vmem [thread:$0]  (!%p4706_p0), %s5249_s8, 512, %s529_s16, [#allocation13], %s4511_s20, %s4511_s20, %s4512_s23  }
  0x5e   : > { %s4513_s29 = smov [#allocation6]   ;;  %s4514_s26 = smov [#allocation11]  }
  0x5f   : > { %s483_s25 = sshll.u32 %s4513_s29, 4  ;;  %s515_s22 = sshll.u32 %s4514_s26, 4  ;;  %s484_s25 = int_to_ptr.vmem [resolvable:$true] %s483_s25  ;;  %s516_s22 = int_to_ptr.vmem [resolvable:$true] %s515_s22 }
  0x60   : > { %s4285_s1 = scalar_lea.hbm %s5244_s3, 512 }
  0x61   : > { %p4286_p3 = scmp.ne.s32.totalorder %s5244_s3, %s4285_s1  ;;  %p4292_p12 = scmp.lt.u32.totalorder %s4285_s1, %s5244_s3 }
  0x63   : > { %p4288_p8 = pnand %p4286_p3, %p4718_p2 }
  0x65   : > { %p4289_p10 = pneg %p4288_p8 }
  0x67   : > { %p4294_p1 = pnand %p4292_p12, %p4289_p10 }
  0x69   : > { %4297 = shalt.err (!%p4294_p1)
}
  0x6a   : > { %s4298_s16 = scalar_lea.vmem %s484_s25, 512  ;;  %p4306_p7 = scmp.lt.s32.totalorder %s484_s25, %s484_s25 }
  0x6b   : > { %p4299_p4 = scmp.ne.s32.totalorder %s484_s25, %s4298_s16  ;;  %p4307_p9 = scmp.lt.s32.totalorder %s4298_s16, %s4298_s16 }
  0x6d   : > { %p4301_p5 = pnand %p4299_p4, %p4718_p2  ;;  %p4308_p11 = por %p4307_p9, %p4306_p7 }
  0x6f   : > { %p4302_p6 = pneg %p4301_p5 }
  0x71   : > { %p4309_p13 = pnand %p4308_p11, %p4302_p6 }
  0x73   : > { %4312 = shalt.err (!%p4309_p13)
}
  0x74   : > { %4076 = dma.hbm_to_vmem [thread:$0]  (!%p4706_p0), %s5244_s3, 512, %s484_s25, [#allocation7], %s4511_s20, %s4511_s20, %s4512_s23  }
  0x75   : > { %s4313_s26 = scalar_lea.hbm %s5248_s7, 512 }
  0x76   : > { %p4314_p3 = scmp.ne.s32.totalorder %s5248_s7, %s4313_s26  ;;  %p4320_p12 = scmp.lt.u32.totalorder %s4313_s26, %s5248_s7 }
  0x78   : > { %p4316_p8 = pnand %p4314_p3, %p4718_p2 }
  0x7a   : > { %p4317_p10 = pneg %p4316_p8 }
  0x7c   : > { %p4322_p1 = pnand %p4320_p12, %p4317_p10 }
  0x7e   : > { %4325 = shalt.err (!%p4322_p1)
}
  0x7f   : > { %s4326_s13 = scalar_lea.vmem %s516_s22, 512  ;;  %p4334_p7 = scmp.lt.s32.totalorder %s516_s22, %s516_s22 }
  0x80   : > { %p4327_p4 = scmp.ne.s32.totalorder %s516_s22, %s4326_s13  ;;  %p4335_p9 = scmp.lt.s32.totalorder %s4326_s13, %s4326_s13 }
  0x82   : > { %p4329_p5 = pnand %p4327_p4, %p4718_p2  ;;  %p4336_p11 = por %p4335_p9, %p4334_p7 }
  0x84   : > { %p4330_p6 = pneg %p4329_p5 }
  0x86   : > { %p4337_p13 = pnand %p4336_p11, %p4330_p6 }
  0x88   : > { %4340 = shalt.err (!%p4337_p13)
}
  0x89   : > { %4082 = dma.hbm_to_vmem [thread:$0]  (!%p4706_p0), %s5248_s7, 512, %s516_s22, [#allocation10], %s4511_s20, %s4511_s20, %s4512_s23  }
  0x8a   : > { %s4515_s4 = smov [#allocation14]   ;;  %s4516_s15 = smov [#allocation15]  }
  0x8b   : > { %s541_s11 = sshll.u32 %s4515_s4, 4  ;;  %s560_s29 = sshll.u32 %s4516_s15, 4  ;;  %s542_s11 = int_to_ptr.vmem [resolvable:$true] %s541_s11  ;;  %s561_s29 = int_to_ptr.vmem [resolvable:$true] %s560_s29 }
  0x8c   : > { %s4341_s17 = scalar_lea.hbm %s5250_s9, 512 }
  0x8d   : > { %p4342_p3 = scmp.ne.s32.totalorder %s5250_s9, %s4341_s17  ;;  %p4348_p12 = scmp.lt.u32.totalorder %s4341_s17, %s5250_s9 }
  0x8f   : > { %p4344_p8 = pnand %p4342_p3, %p4718_p2 }
  0x91   : > { %p4345_p10 = pneg %p4344_p8 }
  0x93   : > { %p4350_p1 = pnand %p4348_p12, %p4345_p10 }
  0x95   : > { %4353 = shalt.err (!%p4350_p1)
}
  0x96   : > { %s4354_s22 = scalar_lea.vmem %s542_s11, 512  ;;  %p4362_p7 = scmp.lt.s32.totalorder %s542_s11, %s542_s11 }
  0x97   : > { %p4355_p4 = scmp.ne.s32.totalorder %s542_s11, %s4354_s22  ;;  %p4363_p9 = scmp.lt.s32.totalorder %s4354_s22, %s4354_s22 }
  0x99   : > { %p4357_p5 = pnand %p4355_p4, %p4718_p2  ;;  %p4364_p11 = por %p4363_p9, %p4362_p7 }
  0x9b   : > { %p4358_p6 = pneg %p4357_p5 }
  0x9d   : > { %p4365_p13 = pnand %p4364_p11, %p4358_p6 }
  0x9f   : > { %4368 = shalt.err (!%p4365_p13)
}
  0xa0   : > { %4088 = dma.hbm_to_vmem [thread:$0]  (!%p4706_p0), %s5250_s9, 512, %s542_s11, [#allocation13], %s4511_s20, %s4511_s20, %s4512_s23  }
  0xa1   : > { %s4369_s21 = scalar_lea.hbm %s5253_s12, 512 }
  0xa2   : > { %p4370_p3 = scmp.ne.s32.totalorder %s5253_s12, %s4369_s21  ;;  %p4376_p12 = scmp.lt.u32.totalorder %s4369_s21, %s5253_s12 }
  0xa4   : > { %p4372_p8 = pnand %p4370_p3, %p4718_p2 }
  0xa6   : > { %p4373_p10 = pneg %p4372_p8 }
  0xa8   : > { %p4378_p1 = pnand %p4376_p12, %p4373_p10 }
  0xaa   : > { %4381 = shalt.err (!%p4378_p1)
}
  0xab   : > { %s4382_s25 = scalar_lea.vmem %s561_s29, 512  ;;  %p4390_p7 = scmp.lt.s32.totalorder %s561_s29, %s561_s29 }
  0xac   : > { %p4383_p4 = scmp.ne.s32.totalorder %s561_s29, %s4382_s25  ;;  %p4391_p9 = scmp.lt.s32.totalorder %s4382_s25, %s4382_s25 }
  0xae   : > { %p4385_p5 = pnand %p4383_p4, %p4718_p2  ;;  %p4392_p11 = por %p4391_p9, %p4390_p7 }
  0xb0   : > { %p4386_p6 = pneg %p4385_p5 }
  0xb2   : > { %p4393_p13 = pnand %p4392_p11, %p4386_p6 }
  0xb4   : > { %4396 = shalt.err (!%p4393_p13)
}
  0xb5   : > { %4091 = dma.hbm_to_vmem [thread:$0]  (!%p4706_p0), %s5253_s12, 512, %s561_s29, [#allocation16], %s4511_s20, %s4511_s20, %s4512_s23  }
  0xb6   : > { %p5304_p3 = scmp.ne.s32.totalorder %s5298_s2, 0 }
  0xb7   : > { %p5305_p2 = scmp.ne.s32.totalorder (!%p5304_p3), %s5299_s19, 0 }
  0xb8   : > { %607 = sbr.rel (%p5304_p3) target bundleno = 4362 (0x110a), region = 92 }
  0xbf   : > { %4458 = dma.done.wait (%p5305_p2), [#allocation7], 512  }
  0xc0   : > { %4460 = vsyncadd (%p5305_p2), [#allocation7], 4294966784 }
  0xc1   : > { %4462 = dma.done.wait (%p5305_p2), [#allocation10], 1024  }
  0xc2   : > { %4464 = vsyncadd (%p5305_p2), [#allocation10], 4294966272 }
  0xc3   : > { %4466 = dma.done.wait (%p5305_p2), [#allocation13], 1024  }
  0xc4   : > { %4468 = vsyncadd (%p5305_p2), [#allocation13], 4294966272 }
  0xc5   : > { %4470 = dma.done.wait (%p5305_p2), [#allocation16], 512  }
  0xc6   : > { %4472 = vsyncadd (%p5305_p2), [#allocation16], 4294966784  ;;  %s683_s18 = sand.u32 1, %s4483_s28   ;;  %p686_p0 = scmp.lt.s32.totalorder %s4495_s0, 1 }
  0xc7   : > { %s4864_s2 = sshll.u32 %s683_s18, 3  ;;  %s5306_s16 = sld [smem:[#allocation33_spill]] }
  0xc8   : > { %s687_s24 = scalar_select %p686_p0, %s4495_s0, 1 }
  0xc9   : > { %s5307_s26 = sld [smem:[#allocation34_spill]]  ;;  %s685_s17 = scalar_lea.vmem [#allocation17], %s4864_s2 }
  0xca   : > { %s3617_s20 = sshll.u32 %s687_s24, 4  ;;  %p3554_p8 = scmp.ne.s32.totalorder %s4491_s30, 0 }
  0xcb   : > { %v702_v0 = vld [vmem:[#allocation6] sm:$0xff] (!%p3554_p8)  ;;  %v703_v1 = vld [vmem:[#allocation6 + $0x8] sm:$0xff] (!%p3554_p8)  ;;  %v704_v2 = vld [vmem:[#allocation6 + $0x10] sm:$0xff] (!%p3554_p8)  ;;  %vm706_vm0 = vcmask (!%p3554_p8), 261120   ;;  %vm808_vm1 = vcmask (!%p3554_p8), 64512   ;;  %s4517_s1 = smov (!%p3554_p8), 112  }
  0xcc   : > { %699 = sbr.rel (%p3554_p8) target bundleno = 689 (0x2b1), region = 120  ;;  %v3945_v3 = vpack.c.bf16 (!%p3554_p8), %v703_v1, %v702_v0  ;;  %v705_v4 = vld [vmem:[#allocation6 + $0x18] sm:$0xff] (!%p3554_p8)  ;;  %v851_v6 = vld [vmem:[#allocation12] sm:$0xff] (!%p3554_p8)  ;;  %v852_v8 = vld [vmem:[#allocation12 + $0x8] sm:$0xff] (!%p3554_p8)  ;;  %s4518_s27 = smov (!%p3554_p8), 120  }
  0xcd   : > { %s4870_s4 = scalar_lea.vmem %s5306_s16, %s3617_s20  ;;  %v3949_v7 = vpack.c.bf16 (!%p3554_p8), %v705_v4, %v704_v2  ;;  %v853_v9 = vld [vmem:[#allocation12 + $0x10] sm:$0xff] (!%p3554_p8)  ;;  %v3953_v10 = vpack.c.bf16 (!%p3554_p8), %v852_v8, %v851_v6  ;;  %v854_v11 = vld [vmem:[#allocation12 + $0x18] sm:$0xff] (!%p3554_p8)  ;;  %s4519_s13 = smov (!%p3554_p8), 104  }
  0xce   : > { %v700_v5 = vld [vmem:[%s4870_s4] sm:$0xff] (!%p3554_p8)  ;;  %3946 = vmatprep.subr.bf16.mxu0 (!%p3554_p8), %v3945_v3  ;;  %v3957_v13 = vpack.c.bf16 (!%p3554_p8), %v854_v11, %v853_v9  ;;  %v701_v14 = vld [vmem:[%s4870_s4 + $0x8] sm:$0xff] (!%p3554_p8)  ;;  %s4520_s25 = smov (!%p3554_p8), 96  }
  0xcf   : > { %s695_s21 = scalar_lea.vmem %s5307_s26, %s3617_s20  ;;  %3727 = vmatprep.mubr.msk.f32.mxu0 (!%p3554_p8), %vm706_vm0, %v700_v5  ;;  %3948 = vmatpush3.bf16.msra.mxu0 (!%p3554_p8), %v3945_v3 }
  0xd0   : > { %v849_v12 = vld [vmem:[%s695_s21] sm:$0xff] (!%p3554_p8)  ;;  %3950 = vmatprep.subr.bf16.mxu0 (!%p3554_p8), %v3949_v7  ;;  %3954 = vmatprep.subr.bf16.mxu1 (!%p3554_p8), %v3953_v10  ;;  %v850_v15 = vld [vmem:[%s695_s21 + $0x8] sm:$0xff] (!%p3554_p8) }
  0xd1   : > { %3738 = vmatprep.mubr.msk.f32.mxu1 (!%p3554_p8), %vm706_vm0, %v849_v12  ;;  %3956 = vmatpush3.bf16.msra.mxu1 (!%p3554_p8), %v3953_v10 }
  0xd2   : > { %3958 = vmatprep.subr.bf16.mxu1 (!%p3554_p8), %v3957_v13 }
  0xd3   : > { %3952 = vmatpush3.bf16.msra.mxu0 %v3949_v7 }
  0xd5   : > { %3960 = vmatpush3.bf16.msra.mxu1 %v3957_v13 }
  0xd6   : > { %3728 = vmatmul.mubr.msk.f32.vlgmr.msra.gmra.mrb[0].mxu0 %vm706_vm0, %v701_v14 }
  0xd8   : > { %3739 = vmatmul.mubr.msk.f32.vlgmr.msra.gmra.mrb[0].mxu1 %vm706_vm0, %v850_v15 }
 0x1a9   : > { %v3729_v16 = vpop.f32.mrb[0].mxu0 }
 0x1aa   : > { %810 = vst.msk [vmem:[#allocation2 + $0x8] sm:$0xff] %vm808_vm1, %v3729_v16  ;;  %798 = vrot.lane.b32.xlu1 %v3729_v16, %s4517_s1  ;;  %792 = vrot.lane.b32.xlu0 %v3729_v16, %s4518_s27  ;;  %v779_v17 = vpop.f32.mrb[1].mxu0 }
 0x1ab   : > { %809 = vst.msk [vmem:[#allocation2] sm:$0xff] %vm808_vm1, %v779_v17  ;;  %v3740_v18 = vpop.f32.mrb[0].mxu1 }
 0x1ac   : > { %957 = vst.msk [vmem:[#allocation4 + $0x8] sm:$0xff] %vm808_vm1, %v3740_v18  ;;  %v927_v19 = vpop.f32.mrb[1].mxu1 }
 0x1ad   : > { %956 = vst.msk [vmem:[#allocation4] sm:$0xff] %vm808_vm1, %v927_v19 }
 0x1ae   : > { %804 = vrot.lane.b32.xlu1 %v3729_v16, %s4519_s13  ;;  %790 = vrot.lane.b32.xlu0 %v779_v17, %s4518_s27 }
 0x1b2   : > { %940 = vrot.lane.b32.xlu1 %v3740_v18, %s4518_s27  ;;  %802 = vrot.lane.b32.xlu0 %v779_v17, %s4519_s13 }
 0x1b6   : > { %946 = vrot.lane.b32.xlu1 %v3740_v18, %s4517_s1  ;;  %938 = vrot.lane.b32.xlu0 %v927_v19, %s4518_s27 }
 0x1ba   : > { %796 = vrot.lane.b32.xlu1 %v779_v17, %s4517_s1  ;;  %944 = vrot.lane.b32.xlu0 %v927_v19, %s4517_s1 }
 0x1be   : > { %952 = vrot.lane.b32.xlu1 %v3740_v18, %s4519_s13  ;;  %950 = vrot.lane.b32.xlu0 %v927_v19, %s4519_s13 }
 0x1c2   : > { %819 = vrot.lane.b32.xlu1 %v3729_v16, %s4520_s25  ;;  %817 = vrot.lane.b32.xlu0 %v779_v17, %s4520_s25 }
 0x1c6   : > { %966 = vrot.lane.b32.xlu1 %v3740_v18, %s4520_s25  ;;  %964 = vrot.lane.b32.xlu0 %v927_v19, %s4520_s25 }
 0x21c   : > { %v799_v20 = vpop.permute.xlu1 %798  ;;  %v793_v21 = vpop.permute.xlu0 %792 }
 0x21d   : > { %814 = vst.msk [vmem:[#allocation2 + $0x28] sm:$0xff] %vm808_vm1, %v799_v20  ;;  %812 = vst.msk [vmem:[#allocation2 + $0x18] sm:$0xff] %vm808_vm1, %v793_v21  ;;  %823 = vrot.lane.b32.xlu1 %v793_v21, %s4520_s25 }
 0x220   : > { %v805_v22 = vpop.permute.xlu1 %804  ;;  %v791_v23 = vpop.permute.xlu0 %790 }
 0x221   : > { %816 = vst.msk [vmem:[#allocation2 + $0x38] sm:$0xff] %vm808_vm1, %v805_v22  ;;  %811 = vst.msk [vmem:[#allocation2 + $0x10] sm:$0xff] %vm808_vm1, %v791_v23  ;;  %827 = vrot.lane.b32.xlu1 %v799_v20, %s4520_s25  ;;  %821 = vrot.lane.b32.xlu0 %v791_v23, %s4520_s25 }
 0x224   : > { %v941_v24 = vpop.permute.xlu1 %940  ;;  %v803_v25 = vpop.permute.xlu0 %802 }
 0x225   : > { %959 = vst.msk [vmem:[#allocation4 + $0x18] sm:$0xff] %vm808_vm1, %v941_v24  ;;  %815 = vst.msk [vmem:[#allocation2 + $0x30] sm:$0xff] %vm808_vm1, %v803_v25  ;;  %831 = vrot.lane.b32.xlu1 %v805_v22, %s4520_s25 }
 0x228   : > { %v947_v26 = vpop.permute.xlu1 %946  ;;  %v939_v27 = vpop.permute.xlu0 %938 }
 0x229   : > { %961 = vst.msk [vmem:[#allocation4 + $0x28] sm:$0xff] %vm808_vm1, %v947_v26  ;;  %958 = vst.msk [vmem:[#allocation4 + $0x10] sm:$0xff] %vm808_vm1, %v939_v27  ;;  %970 = vrot.lane.b32.xlu1 %v941_v24, %s4520_s25 }
 0x22c   : > { %v797_v28 = vpop.permute.xlu1 %796  ;;  %v945_v29 = vpop.permute.xlu0 %944 }
 0x22d   : > { %813 = vst.msk [vmem:[#allocation2 + $0x20] sm:$0xff] %vm808_vm1, %v797_v28  ;;  %960 = vst.msk [vmem:[#allocation4 + $0x20] sm:$0xff] %vm808_vm1, %v945_v29  ;;  %974 = vrot.lane.b32.xlu1 %v947_v26, %s4520_s25  ;;  %825 = vrot.lane.b32.xlu0 %v797_v28, %s4520_s25 }
 0x230   : > { %v953_v30 = vpop.permute.xlu1 %952  ;;  %v951_v31 = vpop.permute.xlu0 %950 }
 0x231   : > { %963 = vst.msk [vmem:[#allocation4 + $0x38] sm:$0xff] %vm808_vm1, %v953_v30  ;;  %962 = vst.msk [vmem:[#allocation4 + $0x30] sm:$0xff] %vm808_vm1, %v951_v31  ;;  %978 = vrot.lane.b32.xlu1 %v953_v30, %s4520_s25  ;;  %829 = vrot.lane.b32.xlu0 %v803_v25, %s4520_s25 }
 0x234   : > { %v820_v32 = vpop.permute.xlu1 %819  ;;  %v818_v33 = vpop.permute.xlu0 %817 }
 0x235   : > { %842 = vst.msk [vmem:[#allocation3 + $0x8] sm:$0xff] %vm808_vm1, %v820_v32  ;;  %841 = vst.msk [vmem:[#allocation3] sm:$0xff] %vm808_vm1, %v818_v33  ;;  %968 = vrot.lane.b32.xlu0 %v939_v27, %s4520_s25 }
 0x238   : > { %v967_v34 = vpop.permute.xlu1 %966  ;;  %v965_v35 = vpop.permute.xlu0 %964 }
 0x239   : > { %989 = vst.msk [vmem:[#allocation5 + $0x8] sm:$0xff] %vm808_vm1, %v967_v34  ;;  %988 = vst.msk [vmem:[#allocation5] sm:$0xff] %vm808_vm1, %v965_v35  ;;  %972 = vrot.lane.b32.xlu0 %v945_v29, %s4520_s25 }
 0x23d   : > { %976 = vrot.lane.b32.xlu0 %v951_v31, %s4520_s25 }
 0x28f   : > { %v824_v36 = vpop.permute.xlu1 %823 }
 0x290   : > { %844 = vst.msk [vmem:[#allocation3 + $0x18] sm:$0xff] %vm808_vm1, %v824_v36 }
 0x293   : > { %v828_v37 = vpop.permute.xlu1 %827  ;;  %v822_v38 = vpop.permute.xlu0 %821 }
 0x294   : > { %846 = vst.msk [vmem:[#allocation3 + $0x28] sm:$0xff] %vm808_vm1, %v828_v37  ;;  %843 = vst.msk [vmem:[#allocation3 + $0x10] sm:$0xff] %vm808_vm1, %v822_v38 }
 0x297   : > { %v832_v39 = vpop.permute.xlu1 %831 }
 0x298   : > { %848 = vst.msk [vmem:[#allocation3 + $0x38] sm:$0xff] %vm808_vm1, %v832_v39 }
 0x29b   : > { %v971_v40 = vpop.permute.xlu1 %970 }
 0x29c   : > { %991 = vst.msk [vmem:[#allocation5 + $0x18] sm:$0xff] %vm808_vm1, %v971_v40 }
 0x29f   : > { %v975_v41 = vpop.permute.xlu1 %974  ;;  %v826_v42 = vpop.permute.xlu0 %825 }
 0x2a0   : > { %993 = vst.msk [vmem:[#allocation5 + $0x28] sm:$0xff] %vm808_vm1, %v975_v41  ;;  %845 = vst.msk [vmem:[#allocation3 + $0x20] sm:$0xff] %vm808_vm1, %v826_v42 }
 0x2a3   : > { %v979_v43 = vpop.permute.xlu1 %978  ;;  %v830_v44 = vpop.permute.xlu0 %829 }
 0x2a4   : > { %995 = vst.msk [vmem:[#allocation5 + $0x38] sm:$0xff] %vm808_vm1, %v979_v43  ;;  %847 = vst.msk [vmem:[#allocation3 + $0x30] sm:$0xff] %vm808_vm1, %v830_v44 }
 0x2a7   : > { %v969_v45 = vpop.permute.xlu0 %968 }
 0x2a8   : > { %990 = vst.msk [vmem:[#allocation5 + $0x10] sm:$0xff] %vm808_vm1, %v969_v45 }
 0x2ab   : > { %v973_v46 = vpop.permute.xlu0 %972 }
 0x2ac   : > { %992 = vst.msk [vmem:[#allocation5 + $0x20] sm:$0xff] %vm808_vm1, %v973_v46 }
 0x2af   : > { %v977_v47 = vpop.permute.xlu0 %976 }
 0x2b0   : > { %994 = vst.msk [vmem:[#allocation5 + $0x30] sm:$0xff] %vm808_vm1, %v977_v47 }
 0x2b1 PF: > { %s5308_s24 = sld [smem:[#allocation35_spill]]  ;;  %v4521_v51 = vmov 0.0|0.0   ;;  %vm4522_vm2 = vmmov 0   ;;  %v4523_v54 = vmov 0.0   ;;  %s3559_s26 = sshll.u32 %s4491_s30, 3  ;;  %v1077_v55 = vld [vmem:[#allocation2] sm:$0xff] }
 0x2b2   : > { %3961 = vmatprep.subr.bf16.mxu0 %v4521_v51  ;;  %3749 = vmatprep.mubr.msk.f32.mxu0 %vm4522_vm2, %v4523_v54  ;;  %v1078_v56 = vld [vmem:[#allocation2 + $0x8] sm:$0xff]  ;;  %vm1104_vm3 = vcmask 64512   ;;  %s997_s21 = scalar_lea.vmem %s4870_s4, %s3559_s26  ;;  %vm1003_vm5 = vcmask 261120   ;;  %v1079_v61 = vld [vmem:[#allocation2 + $0x10] sm:$0xff]  ;;  %v1080_v62 = vld [vmem:[#allocation2 + $0x18] sm:$0xff]  ;;  %s4524_s4 = smov 104  }
 0x2b3   : > { %3967 = vmatprep.subr.bf16.mxu1 %v4521_v51  ;;  %v3968_v57 = vpack.c.bf16 %v1078_v56, %v1077_v55  ;;  %vm4950_vm4 = vmpackc.low %vm1104_vm3, %vm1104_vm3  ;;  %3756 = vmatprep.mubr.msk.f32.mxu1 %vm4522_vm2, %v4523_v54  ;;  %v4961_v60 = vld [vmem:[%s997_s21] sm:$0xff]  ;;  %v3972_v63 = vpack.c.bf16 %v1080_v62, %v1079_v61  ;;  %v1082_v1 = vld [vmem:[#allocation2 + $0x28] sm:$0xff]  ;;  %s4525_s1 = smov 120   ;;  %s4526_s27 = smov 112   ;;  %vm1417_vm6 = vcmask 130048   ;;  %vm3265_vm7 = vcmask 523264  }
 0x2b4   : > { %v1081_v0 = vld [vmem:[#allocation2 + $0x20] sm:$0xff]  ;;  %v1083_v5 = vld [vmem:[#allocation2 + $0x30] sm:$0xff]  ;;  %v1084_v6 = vld [vmem:[#allocation2 + $0x38] sm:$0xff]  ;;  %s5311_s23 = sld [smem:[#allocation37_spill]]  ;;  %s5313_s13 = sld [smem:[#allocation39_spill]] }
 0x2b5   : > { %3970 = vmatpush3.bf16.xpose.msk.msra.mxu1 %vm4950_vm4, %v3968_v57  ;;  %v3976_v2 = vpack.c.bf16 %v1082_v1, %v1081_v0  ;;  %v3980_v7 = vpack.c.bf16 %v1084_v6, %v1083_v5  ;;  %v1085_v14 = vld [vmem:[#allocation3] sm:$0xff]  ;;  %v1086_v15 = vld [vmem:[#allocation3 + $0x8] sm:$0xff]  ;;  %v1087_v26 = vld [vmem:[#allocation3 + $0x10] sm:$0xff]  ;;  %s3613_s25 = sshll.u32 %s4495_s0, 1  ;;  %s5314_s11 = sld [smem:[#allocation29_spill]] }
 0x2b6   : > { %3975 = vmatprep.subr.bf16.mxu1 %v4521_v51  ;;  %v3984_v16 = vpack.c.bf16 %v1086_v15, %v1085_v14  ;;  %v1088_v27 = vld [vmem:[#allocation3 + $0x18] sm:$0xff]  ;;  %v1089_v32 = vld [vmem:[#allocation3 + $0x20] sm:$0xff]  ;;  %v1090_v33 = vld [vmem:[#allocation3 + $0x28] sm:$0xff]  ;;  %s3382_s22 = sadd.s32 %s4491_s30, %s3613_s25  ;;  %s5315_s29 = sld [smem:[#allocation40_spill]] }
 0x2b7   : > { %v999_v48 = vld [vmem:[%s5308_s24] sm:$0xff]  ;;  %v1000_v49 = vld [vmem:[%s5308_s24 + $0x8] sm:$0xff]  ;;  %v1001_v50 = vld [vmem:[%s5308_s24 + $0x10] sm:$0xff]  ;;  %v3987_v28 = vpack.c.bf16 %v1088_v27, %v1087_v26  ;;  %v3990_v34 = vpack.c.bf16 %v1090_v33, %v1089_v32  ;;  %s5316_s19 = sld [smem:[#allocation41_spill]]  ;;  %s3614_s26 = sshll.u32 %s3382_s22, 7 }
 0x2b8   : > { %v3962_v52 = vpack.c.bf16 %v1000_v49, %v999_v48  ;;  %v1002_v53 = vld [vmem:[%s5308_s24 + $0x18] sm:$0xff]  ;;  %v1091_v45 = vld [vmem:[#allocation3 + $0x30] sm:$0xff]  ;;  %v1094_v61 = vld [vmem:[#allocation9 + $0x8] sm:$0xff]  ;;  %s3386_s21 = sshll.u32 %s685_s17, 4  ;;  %s5317_s0 = sld [smem:[#allocation42_spill]]  ;;  %s5185_s21 = int_to_ptr.vmem [resolvable:$true] %s3386_s21 }
 0x2b9   : > { %v3965_v59 = vpack.c.bf16 %v1002_v53, %v1001_v50  ;;  %v1092_v46 = vld [vmem:[#allocation3 + $0x38] sm:$0xff]  ;;  %v2169_v58 = vld [vmem:[#allocation5] sm:$0xff]  ;;  %s3371_s30 = scalar_lea.sflag [#allocation8], %s683_s18  ;;  %s4397_s25 = scalar_lea.vmem %s5185_s21, 128 }
 0x2ba   : > { %3963 = vmatpush3.bf16.msra.mxu0 %v3962_v52  ;;  %v3993_v48 = vpack.c.bf16 %v1092_v46, %v1091_v45  ;;  %v1093_v52 = vld [vmem:[#allocation9] sm:$0xff]  ;;  %v2087_v45 = vld [vmem:[#allocation11 + $0x18] sm:$0xff]  ;;  %p4398_p10 = scmp.ne.s32.totalorder %s5185_s21, %s4397_s25  ;;  %s4527_s22 = smov [#allocation17]  }
 0x2bb   : > { %3964 = vmatprep.subr.bf16.mxu0 %v4521_v51  ;;  %p5319_p12 = scmp.ne.s32.totalorder %s5314_s11, 0  ;;  %s4401_s20 = sshll.u32 %s4527_s22, 4  ;;  %s4402_s20 = int_to_ptr.vmem [resolvable:$false] %s4401_s20 }
 0x2bc   : > { %p4404_p5 = scmp.lt.s32.totalorder %s5185_s21, %s4402_s20 }
 0x2bd   : > { %p4399_p1 = pnand %p4398_p10, %p5319_p12 }
 0x2be   : > { %3966 = vmatpush3.bf16.msra.mxu0 %v3965_v59 }
 0x2bf   : > { %3971 = vmatprep.subr.bf16.mxu0 %v4521_v51  ;;  %p4400_p4 = pneg %p4399_p1 }
 0x2c1   : > { %3750 = vmatmul.mubr.msk.f32.vlgmr.msra.gmra.mrb[0].mxu0 %vm1003_vm5, %v4961_v60 }
 0x2c2   : > { %3763 = vmatprep.mubr.msk.f32.mxu0 %vm4522_vm2, %v4523_v54 }
 0x2c7   : > { %3974 = vmatpush3.bf16.xpose.msk.msra.mxu0 %vm4950_vm4, %v3972_v63 }
 0x2c8   : > { %3979 = vmatprep.subr.bf16.mxu0 %v4521_v51 }
 0x394   : > { %v1073_v3 = vpop.f32.mrb[0].mxu0 }
 0x395   : > { %1102 = vrot.lane.b32.xlu1 %v1073_v3, %s4524_s4  ;;  %1098 = vrot.lane.b32.xlu0 %v1073_v3, %s4525_s1  ;;  %v3751_v4 = vpop.f32.mrb[1].mxu0 }
 0x396   : > { %3757 = vmatmul.mubr.msk.f32.vlgmr.msra.gmra.mrb[0].mxu1 %vm1104_vm3, %v1073_v3 }
 0x397   : > { %3978 = vmatpush3.bf16.xpose.msk.msra.mxu1 %vm4950_vm4, %v3976_v2  ;;  %3770 = vmatprep.mubr.msk.f32.mxu1 %vm4522_vm2, %v4523_v54  ;;  %v1095_v2 = vld [vmem:[#allocation9 + $0x10] sm:$0xff] }
 0x398   : > { %3986 = vmatprep.subr.bf16.mxu1 %v4521_v51 }
 0x399   : > { %1100 = vrot.lane.b32.xlu0 %v1073_v3, %s4526_s27 }
 0x407   : > { %v1099_v8 = vpop.permute.xlu0 %1098  ;;  %v1103_v10 = vpop.permute.xlu1 %1102 }
 0x408   : > { %3764 = vmatmul.mubr.msk.f32.vlgmr.msra.gmra.mrb[2].mxu0 %vm1104_vm3, %v1099_v8 }
 0x409   : > { %3982 = vmatpush3.bf16.xpose.msk.msra.mxu0 %vm4950_vm4, %v3980_v7  ;;  %3777 = vmatprep.mubr.msk.f32.mxu0 %vm4522_vm2, %v4523_v54 }
 0x40a   : > { %3983 = vmatprep.subr.bf16.mxu0 %v4521_v51 }
 0x40b   : > { %v1101_v9 = vpop.permute.xlu0 %1100 }
 0x40c   : > { %3771 = vmatmul.mubr.msk.f32.vlgmr.msra.gmra.mrb[2].mxu1 %vm1104_vm3, %v1101_v9 }
 0x40d   : > { %3791 = vmatprep.mubr.msk.f32.mxu1 %vm4522_vm2, %v4523_v54  ;;  %3988 = vmatpush3.bf16.msra.mxu1 %v3987_v28 }
 0x40e   : > { %3992 = vmatprep.subr.bf16.mxu1 %v4521_v51 }
 0x410   : > { %3778 = vmatmul.mubr.msk.f32.vlgmr.msra.gmra.mrb[4].mxu0 %vm1104_vm3, %v1103_v10  ;;  %v1096_v10 = vld [vmem:[#allocation9 + $0x18] sm:$0xff] }
 0x411   : > { %3784 = vmatprep.mubr.msk.f32.mxu0 %vm4522_vm2, %v4523_v54  ;;  %3985 = vmatpush3.bf16.msra.mxu0 %v3984_v16 }
 0x412   : > { %3989 = vmatprep.subr.bf16.mxu0 %v4521_v51 }
 0x469   : > { %v1179_v11 = vpop.f32.mrb[0].mxu1 }
 0x46a   : > { %v3758_v12 = vpop.f32.mrb[1].mxu1  ;;  %v1418_v13 = vsel %vm1417_vm6, %v1179_v11, -inf }
 0x46b   : > { %1419 = vmax.xlane.f32.xlu1 %v1418_v13 }
 0x4db   : > { %v1257_v17 = vpop.f32.mrb[2].mxu0 }
 0x4dc   : > { %v3765_v18 = vpop.f32.mrb[3].mxu0  ;;  %v1421_v19 = vsel %vm1417_vm6, %v1257_v17, -inf }
 0x4dd   : > { %1422 = vmax.xlane.f32.xlu0 %v1421_v19 }
 0x4df   : > { %v1335_v20 = vpop.f32.mrb[2].mxu1 }
 0x4e0   : > { %v3772_v21 = vpop.f32.mrb[3].mxu1  ;;  %v1424_v22 = vsel %vm1417_vm6, %v1335_v20, -inf }
 0x4e1   : > { %1425 = vmax.xlane.f32.xlu0 %v1424_v22 }
 0x4e3   : > { %v1413_v23 = vpop.f32.mrb[4].mxu0 }
 0x4e4   : > { %v3779_v24 = vpop.f32.mrb[5].mxu0  ;;  %v1427_v25 = vsel %vm1417_vm6, %v1413_v23, -inf }
 0x4e5   : > { %1428 = vmax.xlane.f32.xlu1 %v1427_v25 }
 0x4f8   : > { %v1420_v29 = vpop.xlane.xlu1 %1419 }
 0x4f9   : > { %v1430_v30 = vsub.f32 %v1179_v11, %v1420_v29 }
 0x4fb   : > { %v1434_v31 = vmul.f32 1.442695, %v1430_v30 }
 0x4fd   : > { %4191 = vpow2.f32 %v1434_v31 }
 0x507   : > { %v4192_v35 = vpop.eup %4191 }
 0x508   : > { %3785 = vmatmul.mubr.msk.f32.vlgmr.msra.gmra.mrb[6].mxu0 %vm1417_vm6, %v4192_v35  ;;  %v1442_v36 = vsel %vm1417_vm6, %v4192_v35, 0.0 }
 0x509   : > { %1443 = vadd.xlane.f32.xlu0 %v1442_v36  ;;  %3991 = vmatpush3.bf16.msra.mxu0 %v3990_v34 }
 0x50a   : > { %3798 = vmatprep.mubr.msk.f32.mxu0 %vm4522_vm2, %v4523_v54  ;;  %3808 = vmatprep.subr.mxu0 %v4523_v54 }
 0x56a   : > { %v1423_v37 = vpop.xlane.xlu0 %1422 }
 0x56b   : > { %v1431_v38 = vsub.f32 %v1257_v17, %v1423_v37 }
 0x56d   : > { %v1436_v39 = vmul.f32 1.442695, %v1431_v38 }
 0x56e   : > { %v1426_v40 = vpop.xlane.xlu0 %1425 }
 0x56f   : > { %4193 = vpow2.f32 %v1436_v39  ;;  %v1432_v41 = vsub.f32 %v1335_v20, %v1426_v40 }
 0x571   : > { %v1438_v42 = vmul.f32 1.442695, %v1432_v41  ;;  %v2084_v41 = vld [vmem:[#allocation11] sm:$0xff] }
 0x572   : > { %v1429_v43 = vpop.xlane.xlu1 %1428 }
 0x573   : > { %4195 = vpow2.f32 %v1438_v42  ;;  %v1433_v44 = vsub.f32 %v1413_v23, %v1429_v43  ;;  %v2085_v42 = vld [vmem:[#allocation11 + $0x8] sm:$0xff] }
 0x574   : > { %v3996_v43 = vpack.c.bf16 %v2085_v42, %v2084_v41 }
 0x575   : > { %v1440_v47 = vmul.f32 1.442695, %v1433_v44  ;;  %v2086_v44 = vld [vmem:[#allocation11 + $0x10] sm:$0xff] }
 0x576   : > { %v3999_v46 = vpack.c.bf16 %v2087_v45, %v2086_v44 }
 0x577   : > { %4197 = vpow2.f32 %v1440_v47  ;;  %v2162_v47 = vld [vmem:[#allocation4 + $0x8] sm:$0xff] }
 0x579   : > { %v4194_v49 = vpop.eup %4193 }
 0x57a   : > { %3792 = vmatmul.mubr.msk.f32.vlgmr.msra.gmra.mrb[4].mxu1 %vm1417_vm6, %v4194_v49  ;;  %v1445_v50 = vsel %vm1417_vm6, %v4194_v49, 0.0 }
 0x57b   : > { %1446 = vadd.xlane.f32.xlu1 %v1445_v50  ;;  %3994 = vmatpush3.bf16.msra.mxu1 %v3993_v48 }
 0x57c   : > { %3805 = vmatprep.mubr.msk.f32.mxu1 %vm4522_vm2, %v4523_v54  ;;  %3813 = vmatprep.subr.mxu1 %v4523_v54 }
 0x57d   : > { %v4196_v53 = vpop.eup %4195 }
 0x57e   : > { %3799 = vmatmul.mubr.msk.f32.vlgmr.msra.gmra.mrb[8].mxu0 %vm1417_vm6, %v4196_v53  ;;  %v1448_v55 = vsel %vm1417_vm6, %v4196_v53, 0.0 }
 0x57f   : > { %1449 = vadd.xlane.f32.xlu0 %v1448_v55  ;;  %3809 = vmatpush3.msra.mxu0 %v1093_v52  ;;  %v3581_v55 = vld [vmem:[%s5246_s5] ss:$0 sm:$0xff] }
 0x580   : > { %3810 = vmatprep.mubr.msk.f32.mxu0 %vm4522_vm2, %v4523_v54  ;;  %3818 = vmatprep.subr.mxu0 %v4523_v54 }
 0x581   : > { %v4198_v56 = vpop.eup %4197 }
 0x582   : > { %3806 = vmatmul.mubr.msk.f32.vlgmr.msra.gmra.mrb[6].mxu1 %vm1417_vm6, %v4198_v56  ;;  %v1451_v57 = vsel %vm1417_vm6, %v4198_v56, 0.0 }
 0x583   : > { %1452 = vadd.xlane.f32.xlu1 %v1451_v57  ;;  %3815 = vmatprep.mubr.msk.f32.mxu1 %vm4522_vm2, %v4523_v54  ;;  %v3582_v57 = vld [vmem:[%s5247_s6] ss:$0 sm:$0xff] }
 0x584   : > { %3814 = vmatpush3.msra.mxu1 %v1094_v61 }
 0x585   : > { %3823 = vmatprep.subr.mxu1 %v4523_v54 }
 0x596   : > { %v1444_v59 = vpop.xlane.xlu0 %1443 }
 0x597   : > { %4199 = vrcp.f32 %v1444_v59 }
 0x5a1   : > { %v4200_v62 = vpop.eup %4199 }
 0x5db   : > { %v1523_v63 = vpop.f32.mrb[6].mxu0 }
 0x5dc   : > { %v1750_v0 = vmul.f32 %v4200_v62, %v1523_v63  ;;  %v3786_v1 = vpop.f32.mrb[7].mxu0  ;;  %v2163_v62 = vld [vmem:[#allocation4 + $0x10] sm:$0xff]  ;;  %v2164_v63 = vld [vmem:[#allocation4 + $0x18] sm:$0xff] }
 0x5dd   : > { %v2165_v1 = vld [vmem:[#allocation4 + $0x20] sm:$0xff] }
 0x5de   : > { %3811 = vmatmul.mubr.msk.f32.vlgmr.msra.gmra.mrb[10].mxu0 %vm1104_vm3, %v1750_v0  ;;  %v4006_v0 = vpack.c.bf16 %v2164_v63, %v2163_v62 }
 0x5df   : > { %3819 = vmatpush3.msra.mxu0 %v1095_v2  ;;  %3820 = vmatprep.mubr.msk.f32.mxu0 %vm4522_vm2, %v4523_v54  ;;  %v2166_v2 = vld [vmem:[#allocation4 + $0x28] sm:$0xff] }
 0x5e0   : > { %3995 = vmatprep.subr.bf16.mxu0 %v4521_v51 }
 0x608   : > { %v1447_v3 = vpop.xlane.xlu1 %1446 }
 0x609   : > { %4201 = vrcp.f32 %v1447_v3  ;;  %v4010_v3 = vpack.c.bf16 %v2166_v2, %v2165_v1  ;;  %v2179_v2 = vld [vmem:[#allocation14 + $0x10] sm:$0xff] }
 0x60c   : > { %v1450_v4 = vpop.xlane.xlu0 %1449 }
 0x60d   : > { %4203 = vrcp.f32 %v1450_v4 }
 0x610   : > { %v1453_v5 = vpop.xlane.xlu1 %1452 }
 0x611   : > { %4205 = vrcp.f32 %v1453_v5 }
 0x613   : > { %v4202_v6 = vpop.eup %4201 }
 0x617   : > { %v4204_v11 = vpop.eup %4203 }
 0x61b   : > { %v4206_v15 = vpop.eup %4205 }
 0x64d   : > { %v1596_v7 = vpop.f32.mrb[4].mxu1 }
 0x64e   : > { %v1751_v8 = vmul.f32 %v4202_v6, %v1596_v7  ;;  %v3793_v9 = vpop.f32.mrb[5].mxu1  ;;  %v2167_v6 = vld [vmem:[#allocation4 + $0x30] sm:$0xff]  ;;  %v2168_v7 = vld [vmem:[#allocation4 + $0x38] sm:$0xff] }
 0x650   : > { %3816 = vmatmul.mubr.msk.f32.vlgmr.msra.gmra.mrb[8].mxu1 %vm1104_vm3, %v1751_v8  ;;  %v4014_v8 = vpack.c.bf16 %v2168_v7, %v2167_v6 }
 0x651   : > { %v1669_v12 = vpop.f32.mrb[8].mxu0  ;;  %3824 = vmatpush3.msra.mxu1 %v1096_v10  ;;  %3825 = vmatprep.mubr.msk.f32.mxu1 %vm4522_vm2, %v4523_v54 }
 0x652   : > { %v1752_v13 = vmul.f32 %v4204_v11, %v1669_v12  ;;  %v3800_v14 = vpop.f32.mrb[9].mxu0  ;;  %4001 = vmatprep.subr.bf16.mxu1 %v4521_v51 }
 0x654   : > { %3821 = vmatmul.mubr.msk.f32.vlgmr.msra.gmra.mrb[12].mxu0 %vm1104_vm3, %v1752_v13 }
 0x655   : > { %v1742_v16 = vpop.f32.mrb[6].mxu1  ;;  %3836 = vmatprep.mubr.msk.f32.mxu0 %vm4522_vm2, %v4523_v54  ;;  %3997 = vmatpush3.bf16.msra.mxu0 %v3996_v43 }
 0x656   : > { %v1753_v17 = vmul.f32 %v4206_v15, %v1742_v16  ;;  %v3807_v18 = vpop.f32.mrb[7].mxu1  ;;  %3998 = vmatprep.subr.bf16.mxu0 %v4521_v51  ;;  %v2170_v15 = vld [vmem:[#allocation5 + $0x8] sm:$0xff] }
 0x657   : > { %v4018_v16 = vpack.c.bf16 %v2170_v15, %v2169_v58 }
 0x658   : > { %3826 = vmatmul.mubr.msk.f32.vlgmr.msra.gmra.mrb[10].mxu1 %vm1104_vm3, %v1753_v17 }
 0x659   : > { %3843 = vmatprep.mubr.msk.f32.mxu1 %vm4522_vm2, %v4523_v54  ;;  %4000 = vmatpush3.bf16.msra.mxu0 %v3999_v46  ;;  %v2175_v46 = vld [vmem:[#allocation5 + $0x30] sm:$0xff] }
 0x65a   : > { %4005 = vmatprep.subr.bf16.mxu0 %v4521_v51 }
 0x6b1   : > { %v1823_v19 = vpop.f32.mrb[10].mxu0 }
 0x6b2   : > { %v3812_v20 = vpop.f32.mrb[11].mxu0  ;;  %v2046_v22 = vsel %vm1003_vm5, %v1823_v19, 0.0 }
 0x723   : > { %v1896_v21 = vpop.f32.mrb[8].mxu1 }
 0x724   : > { %v2047_v23 = vsel %vm1003_vm5, %v1896_v21, 0.0  ;;  %v3817_v24 = vpop.f32.mrb[9].mxu1 }
 0x725   : > { %v2048_v25 = vadd.f32 %v2047_v23, %v2046_v22 }
 0x727   : > { %v1969_v26 = vpop.f32.mrb[12].mxu0 }
 0x728   : > { %v2049_v27 = vsel %vm1003_vm5, %v1969_v26, 0.0  ;;  %v3822_v28 = vpop.f32.mrb[13].mxu0  ;;  %v2173_v26 = vld [vmem:[#allocation5 + $0x20] sm:$0xff] }
 0x729   : > { %v2050_v29 = vadd.f32 %v2049_v27, %v2048_v25  ;;  %v2174_v27 = vld [vmem:[#allocation5 + $0x28] sm:$0xff] }
 0x72a   : > { %v4024_v28 = vpack.c.bf16 %v2174_v27, %v2173_v26 }
 0x72b   : > { %v2042_v30 = vpop.f32.mrb[10].mxu1 }
 0x72c   : > { %v2051_v31 = vsel %vm1003_vm5, %v2042_v30, 0.0  ;;  %v3827_v32 = vpop.f32.mrb[11].mxu1 }
 0x72d   : > { %v2052_v33 = vadd.f32 %v2051_v31, %v2050_v29  ;;  %v2171_v32 = vld [vmem:[#allocation5 + $0x10] sm:$0xff] }
 0x72f   : > { %v2053_v34 = vadd.f32 %v2052_v33, %v4961_v60  ;;  %v2161_v60 = vld [vmem:[#allocation4] sm:$0xff]  ;;  %v2172_v33 = vld [vmem:[#allocation5 + $0x18] sm:$0xff] }
 0x730   : > { %v4002_v48 = vpack.c.bf16 %v2162_v47, %v2161_v60  ;;  %v2176_v60 = vld [vmem:[#allocation5 + $0x38] sm:$0xff] }
 0x731   : > { %v2056_v35 = vsel %vm1003_vm5, %v2053_v34, 0.0  ;;  %v4027_v47 = vpack.c.bf16 %v2176_v60, %v2175_v46  ;;  %v3252_v46 = vld [vmem:[%s5255_s14 + $0x10] sm:$0xff] }
 0x732   : > { %2057 = vadd.xlane.f32.xlu0 %v2056_v35  ;;  %4004 = vmatpush3.bf16.xpose.msk.msra.mxu1 %vm4950_vm4, %v4002_v48 }
 0x733   : > { %4009 = vmatprep.subr.bf16.mxu1 %v4521_v51 }
 0x7bf   : > { %v2058_v36 = vpop.xlane.xlu0 %2057 }
 0x7c0   : > { %v2060_v37 = vmul.f32 0.03125, %v2058_v36 }
 0x7c2   : > { %v2061_v38 = vsub.f32 %v2053_v34, %v2060_v37  ;;  %v4021_v34 = vpack.c.bf16 %v2172_v33, %v2171_v32 }
 0x7c4   : > { %v2062_v39 = vmul.f32 %v2061_v38, %v2061_v38 }
 0x7c6   : > { %v2063_v40 = vsel %vm1003_vm5, %v2062_v39, 0.0 }
 0x7c7   : > { %2064 = vadd.xlane.f32.xlu1 %v2063_v40 }
 0x854   : > { %v2065_v49 = vpop.xlane.xlu1 %2064 }
 0x855   : > { %v2066_v50 = vmul.f32 0.03125, %v2065_v49 }
 0x857   : > { %v2067_v52 = vadd.f32 1e-06, %v2066_v50 }
 0x859   : > { %4207 = vrsqrt.f32 %v2067_v52  ;;  %v2177_v52 = vld [vmem:[#allocation14] sm:$0xff] }
 0x863   : > { %v4208_v53 = vpop.eup %4207 }
 0x864   : > { %v2069_v56 = vmul.f32 %v4208_v53, %v2061_v38 }
 0x866   : > { %v2076_v59 = vmul.f32 %v3581_v55, %v2069_v56 }
 0x868   : > { %v5050_v61 = vadd.f32 %v3582_v57, %v2076_v59  ;;  %v2178_v59 = vld [vmem:[#allocation14 + $0x8] sm:$0xff] }
 0x86a   : > { %3837 = vmatmul.mubr.msk.f32.vlgmr.msra.gmra.mrb[14].mxu0 %vm1003_vm5, %v5050_v61 }
 0x86b   : > { %3850 = vmatprep.mubr.msk.f32.mxu0 %vm4522_vm2, %v4523_v54  ;;  %4008 = vmatpush3.bf16.xpose.msk.msra.mxu0 %vm4950_vm4, %v4006_v0 }
 0x86c   : > { %4013 = vmatprep.subr.bf16.mxu0 %v4521_v51 }
 0x93d   : > { %v2157_v4 = vpop.f32.mrb[14].mxu0 }
 0x93e   : > { %2184 = vrot.lane.b32.xlu1 %v2157_v4, %s4526_s27  ;;  %2182 = vrot.lane.b32.xlu0 %v2157_v4, %s4525_s1  ;;  %v3838_v5 = vpop.f32.mrb[15].mxu0  ;;  %s5183_s27 = scalar_lea.hbm %s5317_s0, %s3614_s26 }
 0x93f   : > { %3844 = vmatmul.mubr.msk.f32.vlgmr.msra.gmra.mrb[12].mxu1 %vm1104_vm3, %v2157_v4 }
 0x940   : > { %4012 = vmatpush3.bf16.xpose.msk.msra.mxu1 %vm4950_vm4, %v4010_v3  ;;  %3857 = vmatprep.mubr.msk.f32.mxu1 %vm4522_vm2, %v4523_v54 }
 0x941   : > { %4017 = vmatprep.subr.bf16.mxu1 %v4521_v51 }
 0x942   : > { %2186 = vrot.lane.b32.xlu1 %v2157_v4, %s4524_s4  ;;  %s5312_s4 = sld [smem:[#allocation38_spill]] }
 0x9b0   : > { %v2185_v9 = vpop.permute.xlu1 %2184  ;;  %v2183_v10 = vpop.permute.xlu0 %2182 }
 0x9b1   : > { %3851 = vmatmul.mubr.msk.f32.vlgmr.msra.gmra.mrb[16].mxu0 %vm1104_vm3, %v2183_v10  ;;  %3858 = vmatmul.mubr.msk.f32.vlgmr.msra.gmra.mrb[14].mxu1 %vm1104_vm3, %v2185_v9 }
 0x9b2   : > { %4016 = vmatpush3.bf16.xpose.msk.msra.mxu0 %vm4950_vm4, %v4014_v8  ;;  %3864 = vmatprep.mubr.msk.f32.mxu0 %vm4522_vm2, %v4523_v54 }
 0x9b3   : > { %3871 = vmatprep.mubr.msk.f32.mxu1 %vm4522_vm2, %v4523_v54  ;;  %4023 = vmatprep.subr.bf16.mxu0 %v4521_v51 }
 0x9b4   : > { %v2187_v11 = vpop.permute.xlu1 %2186  ;;  %4019 = vmatpush3.bf16.msra.mxu1 %v4018_v16 }
 0x9b5   : > { %4020 = vmatprep.subr.bf16.mxu1 %v4521_v51 }
 0x9b9   : > { %3865 = vmatmul.mubr.msk.f32.vlgmr.msra.gmra.mrb[18].mxu0 %vm1104_vm3, %v2187_v11 }
 0x9ba   : > { %3885 = vmatprep.mubr.msk.f32.mxu0 %vm4522_vm2, %v4523_v54  ;;  %4025 = vmatpush3.bf16.msra.mxu0 %v4024_v28 }
 0x9bb   : > { %3895 = vmatprep.subr.mxu0 %v4523_v54 }
 0xa12   : > { %v2262_v12 = vpop.f32.mrb[12].mxu1 }
 0xa13   : > { %v3845_v13 = vpop.f32.mrb[13].mxu1  ;;  %v2500_v14 = vsel %vm1417_vm6, %v2262_v12, -inf }
 0xa14   : > { %2501 = vmax.xlane.f32.xlu0 %v2500_v14  ;;  %v2180_v14 = vld [vmem:[#allocation14 + $0x18] sm:$0xff] }
 0xa84   : > { %v2340_v17 = vpop.f32.mrb[16].mxu0  ;;  %v2418_v18 = vpop.f32.mrb[14].mxu1 }
 0xa85   : > { %v3852_v19 = vpop.f32.mrb[17].mxu0  ;;  %v3859_v20 = vpop.f32.mrb[15].mxu1  ;;  %v2506_v21 = vsel %vm1417_vm6, %v2418_v18, -inf  ;;  %v2503_v22 = vsel %vm1417_vm6, %v2340_v17, -inf }
 0xa86   : > { %2507 = vmax.xlane.f32.xlu0 %v2506_v21  ;;  %2504 = vmax.xlane.f32.xlu1 %v2503_v22 }
 0xa8c   : > { %v2496_v23 = vpop.f32.mrb[18].mxu0 }
 0xa8d   : > { %v3866_v24 = vpop.f32.mrb[19].mxu0  ;;  %v2509_v25 = vsel %vm1417_vm6, %v2496_v23, -inf }
 0xa8e   : > { %2510 = vmax.xlane.f32.xlu0 %v2509_v25 }
 0xaa1   : > { %v2502_v29 = vpop.xlane.xlu0 %2501 }
 0xaa2   : > { %v2512_v30 = vsub.f32 %v2262_v12, %v2502_v29 }
 0xaa4   : > { %v2516_v31 = vmul.f32 1.442695, %v2512_v30 }
 0xaa6   : > { %4209 = vpow2.f32 %v2516_v31 }
 0xab0   : > { %v4210_v35 = vpop.eup %4209 }
 0xab1   : > { %3872 = vmatmul.mubr.msk.f32.vlgmr.msra.gmra.mrb[16].mxu1 %vm1417_vm6, %v4210_v35  ;;  %v2524_v36 = vsel %vm1417_vm6, %v4210_v35, 0.0 }
 0xab2   : > { %2525 = vadd.xlane.f32.xlu1 %v2524_v36  ;;  %4022 = vmatpush3.bf16.msra.mxu1 %v4021_v34 }
 0xab3   : > { %3878 = vmatprep.mubr.msk.f32.mxu1 %vm4522_vm2, %v4523_v54  ;;  %4026 = vmatprep.subr.bf16.mxu1 %v4521_v51 }
 0xb13   : > { %v2508_v37 = vpop.xlane.xlu0 %2507  ;;  %v2505_v38 = vpop.xlane.xlu1 %2504 }
 0xb14   : > { %v2514_v39 = vsub.f32 %v2418_v18, %v2508_v37  ;;  %v2513_v40 = vsub.f32 %v2340_v17, %v2505_v38 }
 0xb16   : > { %v2520_v41 = vmul.f32 1.442695, %v2514_v39  ;;  %v2518_v42 = vmul.f32 1.442695, %v2513_v40  ;;  %v3165_v39 = vld [vmem:[#allocation15] sm:$0xff]  ;;  %v3166_v40 = vld [vmem:[#allocation15 + $0x8] sm:$0xff] }
 0xb18   : > { %4211 = vpow2.f32 %v2520_v41  ;;  %v4030_v41 = vpack.c.bf16 %v3166_v40, %v3165_v39 }
 0xb19   : > { %4213 = vpow2.f32 %v2518_v42  ;;  %v3167_v42 = vld [vmem:[#allocation15 + $0x10] sm:$0xff] }
 0xb1b   : > { %v2511_v43 = vpop.xlane.xlu0 %2510 }
 0xb1c   : > { %v2515_v44 = vsub.f32 %v2496_v23, %v2511_v43  ;;  %v3168_v43 = vld [vmem:[#allocation15 + $0x18] sm:$0xff] }
 0xb1e   : > { %v2522_v45 = vmul.f32 1.442695, %v2515_v44  ;;  %v4033_v44 = vpack.c.bf16 %v3168_v43, %v3167_v42 }
 0xb20   : > { %4215 = vpow2.f32 %v2522_v45  ;;  %v3251_v45 = vld [vmem:[%s5255_s14 + $0x8] sm:$0xff] }
 0xb22   : > { %v4212_v48 = vpop.eup %4211 }
 0xb23   : > { %v4214_v49 = vpop.eup %4213  ;;  %3886 = vmatmul.mubr.msk.f32.vlgmr.msra.gmra.mrb[20].mxu0 %vm1417_vm6, %v4212_v48  ;;  %v2530_v50 = vsel %vm1417_vm6, %v4212_v48, 0.0 }
 0xb24   : > { %3879 = vmatmul.mubr.msk.f32.vlgmr.msra.gmra.mrb[18].mxu1 %vm1417_vm6, %v4214_v49  ;;  %2531 = vadd.xlane.f32.xlu1 %v2530_v50  ;;  %v2527_v53 = vsel %vm1417_vm6, %v4214_v49, 0.0  ;;  %v3254_v49 = vld [vmem:[%s5255_s14 + $0x20] sm:$0xff]  ;;  %v3255_v50 = vld [vmem:[%s5255_s14 + $0x28] sm:$0xff] }
 0xb25   : > { %2528 = vadd.xlane.f32.xlu0 %v2527_v53  ;;  %4028 = vmatpush3.bf16.msra.mxu1 %v4027_v47  ;;  %v3253_v47 = vld [vmem:[%s5255_s14 + $0x18] sm:$0xff] }
 0xb26   : > { %3892 = vmatprep.mubr.msk.f32.mxu1 %vm4522_vm2, %v4523_v54  ;;  %3896 = vmatpush3.msra.mxu0 %v2177_v52  ;;  %v4039_v48 = vpack.c.bf16 %v3253_v47, %v3252_v46  ;;  %v4042_v52 = vpack.c.bf16 %v3255_v50, %v3254_v49 }
 0xb27   : > { %3897 = vmatprep.mubr.msk.f32.mxu0 %vm4522_vm2, %v4523_v54  ;;  %3900 = vmatprep.subr.mxu1 %v4523_v54 }
 0xb28   : > { %3905 = vmatprep.subr.mxu0 %v4523_v54 }
 0xb2a   : > { %v4216_v55 = vpop.eup %4215 }
 0xb2b   : > { %3893 = vmatmul.mubr.msk.f32.vlgmr.msra.gmra.mrb[20].mxu1 %vm1417_vm6, %v4216_v55  ;;  %v2533_v56 = vsel %vm1417_vm6, %v4216_v55, 0.0 }
 0xb2c   : > { %2534 = vadd.xlane.f32.xlu0 %v2533_v56  ;;  %3902 = vmatprep.mubr.msk.f32.mxu1 %vm4522_vm2, %v4523_v54 }
 0xb2d   : > { %3901 = vmatpush3.msra.mxu1 %v2178_v59  ;;  %v3604_v59 = vld [vmem:[%s5251_s10] ss:$0 sm:$0xff] }
 0xb2e   : > { %3910 = vmatprep.subr.mxu1 %v4523_v54 }
 0xb3f   : > { %v2526_v57 = vpop.xlane.xlu1 %2525 }
 0xb40   : > { %4217 = vrcp.f32 %v2526_v57 }
 0xb4a   : > { %v4218_v62 = vpop.eup %4217 }
 0xb84   : > { %v2605_v63 = vpop.f32.mrb[16].mxu1 }
 0xb85   : > { %v2832_v0 = vmul.f32 %v4218_v62, %v2605_v63  ;;  %v3873_v1 = vpop.f32.mrb[17].mxu1  ;;  %v3605_v63 = vld [vmem:[%s5311_s23] ss:$0 sm:$0xff]  ;;  %s4403_s23 = scalar_lea.vmem %s4402_s20, 256 }
 0xb86   : > { %p4405_p6 = scmp.lt.s32.totalorder %s4403_s23, %s4397_s25 }
 0xb87   : > { %3898 = vmatmul.mubr.msk.f32.vlgmr.msra.gmra.mrb[22].mxu0 %vm1104_vm3, %v2832_v0 }
 0xb88   : > { %3906 = vmatpush3.msra.mxu0 %v2179_v2  ;;  %3907 = vmatprep.mubr.msk.f32.mxu0 %vm4522_vm2, %v4523_v54  ;;  %v3257_v2 = vld [vmem:[%s5255_s14 + $0x38] sm:$0xff]  ;;  %p4406_p7 = por %p4405_p6, %p4404_p5 }
 0xb89   : > { %4029 = vmatprep.subr.bf16.mxu0 %v4521_v51 }
 0xb8a   : > { %p4407_p9 = pnand %p4406_p7, %p4400_p4 }
 0xbb1   : > { %v2532_v3 = vpop.xlane.xlu1 %2531 }
 0xbb2   : > { %v2529_v4 = vpop.xlane.xlu0 %2528  ;;  %4219 = vrcp.f32 %v2532_v3 }
 0xbb3   : > { %4221 = vrcp.f32 %v2529_v4  ;;  %v3606_v4 = vld [vmem:[%s5312_s4] ss:$0 sm:$0xff] }
 0xbb9   : > { %v2535_v5 = vpop.xlane.xlu0 %2534 }
 0xbba   : > { %4223 = vrcp.f32 %v2535_v5 }
 0xbbc   : > { %v4220_v6 = vpop.eup %4219 }
 0xbbd   : > { %v4222_v8 = vpop.eup %4221 }
 0xbc4   : > { %v4224_v58 = vpop.eup %4223 }
 0xbf6   : > { %v2751_v7 = vpop.f32.mrb[20].mxu0 }
 0xbf7   : > { %v2678_v9 = vpop.f32.mrb[18].mxu1  ;;  %v2834_v10 = vmul.f32 %v4220_v6, %v2751_v7  ;;  %v3887_v11 = vpop.f32.mrb[21].mxu0 }
 0xbf8   : > { %v2833_v12 = vmul.f32 %v4222_v8, %v2678_v9  ;;  %v3880_v13 = vpop.f32.mrb[19].mxu1  ;;  %v3608_v9 = vld [vmem:[%s5313_s13] ss:$0 sm:$0xff]  ;;  %s5318_s13 = smov %s5317_s0 }
 0xbf9   : > { %3908 = vmatmul.mubr.msk.f32.vlgmr.msra.gmra.mrb[24].mxu0 %vm1104_vm3, %v2834_v10 }
 0xbfa   : > { %3903 = vmatmul.mubr.msk.f32.vlgmr.msra.gmra.mrb[22].mxu1 %vm1104_vm3, %v2833_v12  ;;  %3923 = vmatprep.mubr.msk.f32.mxu0 %vm4522_vm2, %v4523_v54 }
 0xbfb   : > { %3911 = vmatpush3.msra.mxu1 %v2180_v14  ;;  %3912 = vmatprep.mubr.msk.f32.mxu1 %vm4522_vm2, %v4523_v54 }
 0xbfc   : > { %4035 = vmatprep.subr.bf16.mxu1 %v4521_v51  ;;  %4031 = vmatpush3.bf16.msra.mxu0 %v4030_v41 }
 0xbfd   : > { %4032 = vmatprep.subr.bf16.mxu0 %v4521_v51 }
 0xbfe   : > { %v2824_v15 = vpop.f32.mrb[20].mxu1 }
 0xbff   : > { %v2835_v16 = vmul.f32 %v4224_v58, %v2824_v15  ;;  %v3894_v17 = vpop.f32.mrb[21].mxu1 }
 0xc00   : > { %4034 = vmatpush3.bf16.msra.mxu0 %v4033_v44 }
 0xc01   : > { %3913 = vmatmul.mubr.msk.f32.vlgmr.msra.gmra.mrb[24].mxu1 %vm1104_vm3, %v2835_v16 }
 0xc02   : > { %3942 = vmatprep.mubr.msk.f32.mxu1 %vm4522_vm2, %v4523_v54 }
 0xc5a   : > { %v2905_v18 = vpop.f32.mrb[22].mxu0 }
 0xc5b   : > { %v3899_v19 = vpop.f32.mrb[23].mxu0  ;;  %v3128_v23 = vsel %vm1003_vm5, %v2905_v18, 0.0 }
 0xccc   : > { %v3051_v20 = vpop.f32.mrb[24].mxu0 }
 0xccd   : > { %v2978_v21 = vpop.f32.mrb[22].mxu1  ;;  %v3909_v22 = vpop.f32.mrb[25].mxu0  ;;  %v3131_v27 = vsel %vm1003_vm5, %v3051_v20, 0.0 }
 0xcce   : > { %v3129_v24 = vsel %vm1003_vm5, %v2978_v21, 0.0  ;;  %v3904_v25 = vpop.f32.mrb[23].mxu1 }
 0xccf   : > { %v3130_v26 = vadd.f32 %v3129_v24, %v3128_v23  ;;  %v3610_v23 = vld [vmem:[%s5315_s29] ss:$0 sm:$0xff] }
 0xcd0   : > { %v3611_v25 = vld [vmem:[%s5316_s19] ss:$0 sm:$0xff] }
 0xcd1   : > { %v3132_v28 = vadd.f32 %v3131_v27, %v3130_v26 }
 0xcd4   : > { %v3124_v29 = vpop.f32.mrb[24].mxu1 }
 0xcd5   : > { %v3133_v30 = vsel %vm1003_vm5, %v3124_v29, 0.0  ;;  %v3914_v31 = vpop.f32.mrb[25].mxu1 }
 0xcd6   : > { %v3134_v32 = vadd.f32 %v3133_v30, %v3132_v28 }
 0xcd8   : > { %v3135_v54 = vadd.f32 %v3134_v32, %v5050_v61  ;;  %v3250_v61 = vld [vmem:[%s5255_s14] sm:$0xff] }
 0xcd9   : > { %v4036_v60 = vpack.c.bf16 %v3251_v45, %v3250_v61 }
 0xcda   : > { %v3138_v33 = vsel %vm1003_vm5, %v3135_v54, 0.0 }
 0xcdb   : > { %3139 = vadd.xlane.f32.xlu1 %v3138_v33  ;;  %4037 = vmatpush3.bf16.msra.mxu1 %v4036_v60 }
 0xcdc   : > { %4038 = vmatprep.subr.bf16.mxu1 %v4521_v51 }
 0xcdf   : > { %4040 = vmatpush3.bf16.msra.mxu1 %v4039_v48 }
 0xce0   : > { %4041 = vmatprep.subr.bf16.mxu1 %v4521_v51 }
 0xce3   : > { %4043 = vmatpush3.bf16.msra.mxu1 %v4042_v52 }
 0xce4   : > { %4044 = vmatprep.subr.bf16.mxu1 %v4521_v51  ;;  %v3256_v51 = vld [vmem:[%s5255_s14 + $0x30] sm:$0xff] }
 0xce5   : > { %v4045_v3 = vpack.c.bf16 %v3257_v2, %v3256_v51 }
 0xce7   : > { %4046 = vmatpush3.bf16.msra.mxu1 %v4045_v3 }
 0xd68   : > { %v3140_v34 = vpop.xlane.xlu1 %3139 }
 0xd69   : > { %v3141_v35 = vmul.f32 0.03125, %v3140_v34 }
 0xd6b   : > { %v3142_v36 = vsub.f32 %v3135_v54, %v3141_v35 }
 0xd6d   : > { %v3143_v37 = vmul.f32 %v3142_v36, %v3142_v36 }
 0xd6f   : > { %v3144_v38 = vsel %vm1003_vm5, %v3143_v37, 0.0 }
 0xd70   : > { %3145 = vadd.xlane.f32.xlu0 %v3144_v38 }
 0xdfd   : > { %v3146_v53 = vpop.xlane.xlu0 %3145 }
 0xdfe   : > { %v3147_v55 = vmul.f32 0.03125, %v3146_v53 }
 0xe00   : > { %v3148_v56 = vadd.f32 1e-06, %v3147_v55 }
 0xe02   : > { %4225 = vrsqrt.f32 %v3148_v56 }
 0xe0c   : > { %v4226_v57 = vpop.eup %4225 }
 0xe0d   : > { %v3150_v62 = vmul.f32 %v4226_v57, %v3142_v36 }
 0xe0f   : > { %v3157_v0 = vmul.f32 %v3604_v59, %v3150_v62 }
 0xe11   : > { %v3164_v1 = vadd.f32 %v3605_v63, %v3157_v0 }
 0xe13   : > { %3924 = vmatmul.mubr.msk.f32.vlgmr.msra.gmra.mrb[26].mxu0 %vm1003_vm5, %v3164_v1 }
 0xee6   : > { %v3245_v5 = vpop.f32.mrb[26].mxu0 }
 0xee7   : > { %v3246_v6 = vadd.f32 %v3606_v4, %v3245_v5  ;;  %v3925_v7 = vpop.f32.mrb[27].mxu0 }
 0xee9   : > { %v3249_v8 = vmax.f32 %v3246_v6, 0.0 }
 0xeeb   : > { %3943 = vmatmul.mubr.msk.f32.vlgmr.msra.gmra.mrb[26].mxu1 %vm3265_vm7, %v3249_v8 }
 0xfbe   : > { %v3335_v10 = vpop.f32.mrb[26].mxu1 }
 0xfbf   : > { %v3336_v11 = vadd.f32 %v3608_v9, %v3335_v10  ;;  %v3944_v12 = vpop.f32.mrb[27].mxu1 }
 0xfc1   : > { %v3339_v13 = vadd.f32 %v3336_v11, %v3164_v1 }
 0xfc3   : > { %v3342_v14 = vsel %vm1003_vm5, %v3339_v13, 0.0 }
 0xfc4   : > { %3343 = vadd.xlane.f32.xlu1 %v3342_v14 }
0x1051   : > { %v3344_v58 = vpop.xlane.xlu1 %3343 }
0x1052   : > { %v3345_v15 = vmul.f32 0.03125, %v3344_v58 }
0x1054   : > { %v3346_v16 = vsub.f32 %v3339_v13, %v3345_v15 }
0x1056   : > { %v3347_v17 = vmul.f32 %v3346_v16, %v3346_v16 }
0x1058   : > { %v3348_v18 = vsel %vm1003_vm5, %v3347_v17, 0.0 }
0x1059   : > { %3349 = vadd.xlane.f32.xlu0 %v3348_v18 }
0x10e6   : > { %v3350_v19 = vpop.xlane.xlu0 %3349 }
0x10e7   : > { %v3351_v20 = vmul.f32 0.03125, %v3350_v19 }
0x10e9   : > { %v3352_v21 = vadd.f32 1e-06, %v3351_v20 }
0x10eb   : > { %4227 = vrsqrt.f32 %v3352_v21 }
0x10f5   : > { %v4228_v22 = vpop.eup %4227 }
0x10f6   : > { %v3354_v24 = vmul.f32 %v4228_v22, %v3346_v16 }
0x10f8   : > { %v3361_v26 = vmul.f32 %v3610_v23, %v3354_v24 }
0x10fa   : > { %v3368_v27 = vadd.f32 %v3611_v25, %v3361_v26 }
0x10fc   : > { %3369 = vst.msk [vmem:[%s685_s17] sm:$0xff] %vm1003_vm5, %v3368_v27 }
0x10fd   : > { %4410 = shalt.err (!%p4407_p9)
}
0x10fe   : > { %s4411_s18 = scalar_lea.hbm %s5183_s27, 128  ;;  %s4415_s29 = scalar_lea.hbm %s5318_s13, 512 }
0x10ff   : > { %p4412_p11 = scmp.ne.s32.totalorder %s5183_s27, %s4411_s18  ;;  %p4416_p2 = scmp.lt.u32.totalorder %s5183_s27, %s5318_s13 }
0x1100   : > { %p4417_p0 = scmp.lt.u32.totalorder %s4415_s29, %s4411_s18  ;;  %p4419_p10 = scmp.lt.u32.totalorder %s4411_s18, %s5183_s27 }
0x1101   : > { %p4413_p13 = pnand %p4412_p11, %p5319_p12 }
0x1102   : > { %p4418_p8 = por %p4417_p0, %p4416_p2 }
0x1103   : > { %p4414_p3 = pneg %p4413_p13 }
0x1104   : > { %p4420_p1 = por %p4419_p10, %p4418_p8 }
0x1106   : > { %p4421_p4 = pnand %p4420_p1, %p4414_p3 }
0x1108   : > { %4424 = shalt.err (!%p4421_p4)
}
0x1109   : > { %4071 = dma.vmem_to_hbm [thread:$0]  (%p5319_p12), %s5185_s21, 128, %s5183_s27, %s3371_s30  }
0x110a PF: > { %s5320_s19 = sld [smem:[#allocation27_spill]]  ;;  %s5321_s26 = sld [smem:[#allocation23_spill]] }
0x110b   : > { %s5322_s4 = sld [smem:[#allocation31_spill]] }
0x1110   : > { %p4108_p5 = scmp.ge.s32.totalorder %s5320_s19, 2  ;;  %s3398_s1 = sand.u32 1, %s5321_s26  }
0x1111   : > { %p5323_p6 = scmp.ne.s32.totalorder %s5322_s4, 0  ;;  %s3399_s0 = scalar_lea.sflag [#allocation8], %s3398_s1 }
0x1113   : > { %p4093_p7 = pnand %p4108_p5, %p5323_p6 }
0x1115   : > { %4474 = dma.done.wait (!%p4093_p7), %s3399_s0, 128  }
0x1116   : > { %4476 = vsyncadd (!%p4093_p7), %s3399_s0, 4294967168  ;;  %s35_s20 = sadd.s32 1, %s5320_s19   ;;  %s5324_s25 = sld [smem:[#allocation24_spill]] }
0x1117   : > { %p32_p9 = scmp.ge.s32.totalorder %s35_s20, 6   ;;  %s5325_s29 = sld [smem:[#allocation32_spill]] }
0x1118   : > { %s5326_s30 = sld [smem:[#allocation25_spill]]  ;;  %s5327_s0 = sld [smem:[#allocation26_spill]] }
0x1119   : > { %s5328_s19 = sld [smem:[#allocation28_spill]]  ;;  %s5329_s1 = sld [smem:[#allocation30_spill]] }
0x111a   : > { %s5330_s27 = smov %s4483_s28  ;;  %34 = sbr.rel (!%p32_p9) target bundleno = 20 (0x14), region = 160 }
0x111c   : > { %s5331_s28 = smov %s5324_s25 }
0x1121   :  { %3404 = vsyncpa [#allocation7], 1 }
0x1122   :  { %3406 = vsyncpa [#allocation7 + $0x1], 1 }
0x1123   :  { %3407 = vsyncpa [#allocation10], 1 }
0x1124   :  { %3408 = vsyncpa [#allocation13], 1 }
0x1125   :  { %3409 = vsyncpa [#allocation16], 1 }
0x1126   :  { %3410 = vsyncpa [#allocation8], 1 }
0x1127   :  { %3412 = vsyncpa [#allocation8 + $0x1], 1 }

</bundles_post_ra>
